<compile_context>
chip_gen: v5e
topology: v5e:2x2
jax: 0.10.0
libtpu: 0.0.40
codegen_flags: <defaults>
</compile_context>

<pallas_src>
import functools

import jax
import jax.numpy as jnp
from jax import lax
from jax.experimental import pallas as pl
from jax.experimental.pallas import tpu as pltpu

KH = KW = 3   # Conv2d kernel size (in_channels == 1)
SUB = 8       # (b, t) rows processed per inner chunk (one sublane group)


def td_conv_kernel(x_ref, w_ref, b_ref, o_ref, *, cout, h, w, n_chunks):
    """One grid step: a (BT_TILE, H*W) slab of flattened timesteps.

    x_ref: (BT_TILE, H*W)       VMEM, (h, w) flattened onto the lane axis
    w_ref: (cout, 9)            SMEM, flattened 3x3 filters
    b_ref: (cout,)              SMEM, bias
    o_ref: (BT_TILE, cout*H*W)  VMEM, lane-dense output
    """
    hw = h * w

    # ---- chunk-invariant values, hoisted out of the inner loop -------------
    # Tap weights / bias as SMEM scalars (read once, reused by every chunk).
    wts = [[w_ref[c, k] for k in range(KH * KW)] for c in range(cout)]
    bias = [b_ref[c] for c in range(cout)]

    # Column index of every flattened pixel, for left/right edge masking.
    col = lax.broadcasted_iota(jnp.int32, (SUB, hw), 1) % w
    is_first_col = col == 0
    is_last_col = col == (w - 1)

    zpad = jnp.zeros((SUB, w + 1), jnp.float32)

    def chunk_body(ci, carry):
        s0 = pl.multiple_of(ci * SUB, SUB)
        xs = x_ref[pl.ds(s0, SUB), :].astype(jnp.float32)        # (SUB, hw)

        # Source-side edge masking: after flattening (h, w) -> h*w, a tap with
        # dw = -1 at w == 0 would read the previous row's last column (and
        # dw = +1 at w == W-1 the next row's first column); zero those source
        # columns.  Top/bottom (dh) boundaries are handled by the explicit
        # (w+1)-wide zero padding on both ends of the flat axis.
        xs_dwm1 = jnp.where(is_last_col, 0.0, xs)    # used by taps with dw == -1
        xs_dwp1 = jnp.where(is_first_col, 0.0, xs)   # used by taps with dw == +1
        xe = {
            -1: jnp.concatenate([zpad, xs_dwm1, zpad], axis=1),
             0: jnp.concatenate([zpad, xs,      zpad], axis=1),
             1: jnp.concatenate([zpad, xs_dwp1, zpad], axis=1),
        }

        # acc_c = sum_k w[c, k] * shift_k(x)      (VPU, lane-dense)
        # Bias is folded into the final store (scalar + vector), so the first
        # tap initializes the accumulator directly (no bias splat per chunk).
        accs = [None] * cout
        k = 0
        for dh in (-1, 0, 1):
            for dw in (-1, 0, 1):
                start = (w + 1) + dh * w + dw          # static slice offset
                tap = xe[dw][:, start:start + hw]      # (SUB, hw)
                for c in range(cout):
                    contrib = tap * wts[c][k]
                    accs[c] = contrib if accs[c] is None else accs[c] + contrib
                k += 1

        # Lane-dense stores: channel c occupies lanes [c*hw, (c+1)*hw).
        for c in range(cout):
            o_ref[pl.ds(s0, SUB), pl.ds(c * hw, hw)] = (
                accs[c] + bias[c]).astype(o_ref.dtype)
        return carry

    lax.fori_loop(0, n_chunks, chunk_body, 0)


def time_distributed_conv(x, weight, bias, *, bt_tile_target=512):
    """TimeDistributed(Conv2d(1, Cout, 3, padding=1)) forward.

    x: (B, T, H, W) f32; weight: (Cout, 1, 3, 3); bias: (Cout,).
    Returns (B, T, Cout, H, W), matching the PyTorch module.
    """
    B, T, H, W = x.shape
    Cout = weight.shape[0]
    HW = H * W
    BT = B * T

    # Flatten (B, T) -> one parallel axis and (H, W) -> the lane axis (free,
    # contiguous reshape in the wrapper).
    xf = x.reshape(BT, HW)

    # Tile along the flattened batch*time axis: large enough to amortize the
    # ~0.35 us per-grid-step overhead, small enough that the double-buffered
    # (in + out) footprint stays well under every generation's VMEM budget
    # (v7x: 64 MiB physical / 32 MiB scoped).
    itemsize = jnp.dtype(x.dtype).itemsize
    bytes_per_row = (HW + Cout * HW) * max(itemsize, 4)
    vmem_budget = 12 * 1024 * 1024                 # per-block (x2 for buffers)
    max_rows = max(SUB, (vmem_budget // bytes_per_row) // SUB * SUB)
    bt_tile = min(bt_tile_target, max_rows, pl.cdiv(BT, SUB) * SUB)
    bt_tile = max(SUB, (bt_tile // SUB) * SUB)

    bt_pad = pl.cdiv(BT, bt_tile) * bt_tile
    if bt_pad != BT:
        xf = jnp.pad(xf, ((0, bt_pad - BT), (0, 0)))

    w2 = weight.reshape(Cout, KH * KW).astype(jnp.float32)
    b1 = bias.reshape(Cout).astype(jnp.float32)

    kern = functools.partial(td_conv_kernel, cout=Cout, h=H, w=W,
                             n_chunks=bt_tile // SUB)
    out = pl.pallas_call(
        kern,
        out_shape=jax.ShapeDtypeStruct((bt_pad, Cout * HW), x.dtype),
        grid_spec=pltpu.PrefetchScalarGridSpec(
            num_scalar_prefetch=0,
            grid=(bt_pad // bt_tile,),
            in_specs=[
                pl.BlockSpec((bt_tile, HW), lambda i: (i, 0)),
                pl.BlockSpec(memory_space=pltpu.MemorySpace.SMEM),   # weights
                pl.BlockSpec(memory_space=pltpu.MemorySpace.SMEM),   # bias
            ],
            out_specs=pl.BlockSpec((bt_tile, Cout * HW), lambda i: (i, 0)),
        ),
        compiler_params=pltpu.CompilerParams(
            dimension_semantics=("parallel",),
            vmem_limit_bytes=32 * 1024 * 1024,
        ),
    )(xf, w2, b1)

    return out[:BT].reshape(B, T, Cout, H, W)


def reference(x, weight, bias):
    """Pure-JAX reference of TimeDistributed(Conv2d(1, Cout, 3, padding=1))."""
    B, T, H, W = x.shape
    xp = jnp.pad(x, ((0, 0), (0, 0), (1, 1), (1, 1)))
    out = jnp.zeros((B, T, weight.shape[0], H, W), jnp.float32)
    for kh in range(KH):
        for kw in range(KW):
            wk = weight[:, 0, kh, kw][None, None, :, None, None]
            out = out + wk * xp[:, :, None, kh:kh + H, kw:kw + W]
    return out + bias[None, None, :, None, None]


if __name__ == "__main__":
    key = jax.random.PRNGKey(0)
    kx, kw_, kb = jax.random.split(key, 3)

    B, T, H, W, Cout = 2, 4, 16, 16, 8
    x = jax.random.normal(kx, (B, T, H, W), jnp.float32)
    # Deterministic synthetic Conv2d(1, Cout, 3, padding=1) parameters.
    weight = 0.1 * jax.random.normal(kw_, (Cout, 1, KH, KW), jnp.float32)
    bias = 0.1 * jax.random.normal(kb, (Cout,), jnp.float32)

    # TODO(synk): TimeDistributed wraps an arbitrary nn.Module; only the
    # Conv2d(1, Cout, 3, padding=1) instantiation is implemented as a kernel.
    out = time_distributed_conv(x, weight, bias)
    out = jax.block_until_ready(out)

    ref = reference(x, weight, bias)
    assert out.shape == (B, T, Cout, H, W), out.shape
    assert jnp.allclose(out, ref, atol=1e-5, rtol=1e-5), "mismatch vs reference"
    print("KERNEL_OK")
</pallas_src>

<mosaic_0001>
module attributes {stable_mosaic.version = 11 : i64} {
  func.func @td_conv_kernel(%arg0: i32, %arg1: memref<8x256xf32, #tpu.memory_space<vmem>>, %arg2: memref<8x9xf32, #tpu.memory_space<smem>>, %arg3: memref<8xf32, #tpu.memory_space<smem>>, %arg4: memref<8x2048xf32, #tpu.memory_space<vmem>>) attributes {dimension_semantics = [#tpu.dimension_semantics<parallel>], iteration_bounds = array<i64: 1>, scalar_prefetch = 0 : i64, scratch_operands = 0 : i64, tpu.core_type = #tpu.core_type<tc>, window_params = [{transform_indices = @transform_0, window_bounds = array<i64: 8, 256>}, {transform_indices = @transform_1, window_bounds = array<i64: 8, 9>}, {transform_indices = @transform_2, window_bounds = array<i64: 8>}, {transform_indices = @transform_3, window_bounds = array<i64: 8, 2048>}]} {
    %c0 = arith.constant 0 : index
    %c0_0 = arith.constant 0 : index
    %0 = memref.load %arg2[%c0, %c0_0] : memref<8x9xf32, #tpu.memory_space<smem>>
    %c0_1 = arith.constant 0 : index
    %c1 = arith.constant 1 : index
    %1 = memref.load %arg2[%c0_1, %c1] : memref<8x9xf32, #tpu.memory_space<smem>>
    %c0_2 = arith.constant 0 : index
    %c2 = arith.constant 2 : index
    %2 = memref.load %arg2[%c0_2, %c2] : memref<8x9xf32, #tpu.memory_space<smem>>
    %c0_3 = arith.constant 0 : index
    %c3 = arith.constant 3 : index
    %3 = memref.load %arg2[%c0_3, %c3] : memref<8x9xf32, #tpu.memory_space<smem>>
    %c0_4 = arith.constant 0 : index
    %c4 = arith.constant 4 : index
    %4 = memref.load %arg2[%c0_4, %c4] : memref<8x9xf32, #tpu.memory_space<smem>>
    %c0_5 = arith.constant 0 : index
    %c5 = arith.constant 5 : index
    %5 = memref.load %arg2[%c0_5, %c5] : memref<8x9xf32, #tpu.memory_space<smem>>
    %c0_6 = arith.constant 0 : index
    %c6 = arith.constant 6 : index
    %6 = memref.load %arg2[%c0_6, %c6] : memref<8x9xf32, #tpu.memory_space<smem>>
    %c0_7 = arith.constant 0 : index
    %c7 = arith.constant 7 : index
    %7 = memref.load %arg2[%c0_7, %c7] : memref<8x9xf32, #tpu.memory_space<smem>>
    %c0_8 = arith.constant 0 : index
    %c8 = arith.constant 8 : index
    %8 = memref.load %arg2[%c0_8, %c8] : memref<8x9xf32, #tpu.memory_space<smem>>
    %c1_9 = arith.constant 1 : index
    %c0_10 = arith.constant 0 : index
    %9 = memref.load %arg2[%c1_9, %c0_10] : memref<8x9xf32, #tpu.memory_space<smem>>
    %c1_11 = arith.constant 1 : index
    %c1_12 = arith.constant 1 : index
    %10 = memref.load %arg2[%c1_11, %c1_12] : memref<8x9xf32, #tpu.memory_space<smem>>
    %c1_13 = arith.constant 1 : index
    %c2_14 = arith.constant 2 : index
    %11 = memref.load %arg2[%c1_13, %c2_14] : memref<8x9xf32, #tpu.memory_space<smem>>
    %c1_15 = arith.constant 1 : index
    %c3_16 = arith.constant 3 : index
    %12 = memref.load %arg2[%c1_15, %c3_16] : memref<8x9xf32, #tpu.memory_space<smem>>
    %c1_17 = arith.constant 1 : index
    %c4_18 = arith.constant 4 : index
    %13 = memref.load %arg2[%c1_17, %c4_18] : memref<8x9xf32, #tpu.memory_space<smem>>
    %c1_19 = arith.constant 1 : index
    %c5_20 = arith.constant 5 : index
    %14 = memref.load %arg2[%c1_19, %c5_20] : memref<8x9xf32, #tpu.memory_space<smem>>
    %c1_21 = arith.constant 1 : index
    %c6_22 = arith.constant 6 : index
    %15 = memref.load %arg2[%c1_21, %c6_22] : memref<8x9xf32, #tpu.memory_space<smem>>
    %c1_23 = arith.constant 1 : index
    %c7_24 = arith.constant 7 : index
    %16 = memref.load %arg2[%c1_23, %c7_24] : memref<8x9xf32, #tpu.memory_space<smem>>
    %c1_25 = arith.constant 1 : index
    %c8_26 = arith.constant 8 : index
    %17 = memref.load %arg2[%c1_25, %c8_26] : memref<8x9xf32, #tpu.memory_space<smem>>
    %c2_27 = arith.constant 2 : index
    %c0_28 = arith.constant 0 : index
    %18 = memref.load %arg2[%c2_27, %c0_28] : memref<8x9xf32, #tpu.memory_space<smem>>
    %c2_29 = arith.constant 2 : index
    %c1_30 = arith.constant 1 : index
    %19 = memref.load %arg2[%c2_29, %c1_30] : memref<8x9xf32, #tpu.memory_space<smem>>
    %c2_31 = arith.constant 2 : index
    %c2_32 = arith.constant 2 : index
    %20 = memref.load %arg2[%c2_31, %c2_32] : memref<8x9xf32, #tpu.memory_space<smem>>
    %c2_33 = arith.constant 2 : index
    %c3_34 = arith.constant 3 : index
    %21 = memref.load %arg2[%c2_33, %c3_34] : memref<8x9xf32, #tpu.memory_space<smem>>
    %c2_35 = arith.constant 2 : index
    %c4_36 = arith.constant 4 : index
    %22 = memref.load %arg2[%c2_35, %c4_36] : memref<8x9xf32, #tpu.memory_space<smem>>
    %c2_37 = arith.constant 2 : index
    %c5_38 = arith.constant 5 : index
    %23 = memref.load %arg2[%c2_37, %c5_38] : memref<8x9xf32, #tpu.memory_space<smem>>
    %c2_39 = arith.constant 2 : index
    %c6_40 = arith.constant 6 : index
    %24 = memref.load %arg2[%c2_39, %c6_40] : memref<8x9xf32, #tpu.memory_space<smem>>
    %c2_41 = arith.constant 2 : index
    %c7_42 = arith.constant 7 : index
    %25 = memref.load %arg2[%c2_41, %c7_42] : memref<8x9xf32, #tpu.memory_space<smem>>
    %c2_43 = arith.constant 2 : index
    %c8_44 = arith.constant 8 : index
    %26 = memref.load %arg2[%c2_43, %c8_44] : memref<8x9xf32, #tpu.memory_space<smem>>
    %c3_45 = arith.constant 3 : index
    %c0_46 = arith.constant 0 : index
    %27 = memref.load %arg2[%c3_45, %c0_46] : memref<8x9xf32, #tpu.memory_space<smem>>
    %c3_47 = arith.constant 3 : index
    %c1_48 = arith.constant 1 : index
    %28 = memref.load %arg2[%c3_47, %c1_48] : memref<8x9xf32, #tpu.memory_space<smem>>
    %c3_49 = arith.constant 3 : index
    %c2_50 = arith.constant 2 : index
    %29 = memref.load %arg2[%c3_49, %c2_50] : memref<8x9xf32, #tpu.memory_space<smem>>
    %c3_51 = arith.constant 3 : index
    %c3_52 = arith.constant 3 : index
    %30 = memref.load %arg2[%c3_51, %c3_52] : memref<8x9xf32, #tpu.memory_space<smem>>
    %c3_53 = arith.constant 3 : index
    %c4_54 = arith.constant 4 : index
    %31 = memref.load %arg2[%c3_53, %c4_54] : memref<8x9xf32, #tpu.memory_space<smem>>
    %c3_55 = arith.constant 3 : index
    %c5_56 = arith.constant 5 : index
    %32 = memref.load %arg2[%c3_55, %c5_56] : memref<8x9xf32, #tpu.memory_space<smem>>
    %c3_57 = arith.constant 3 : index
    %c6_58 = arith.constant 6 : index
    %33 = memref.load %arg2[%c3_57, %c6_58] : memref<8x9xf32, #tpu.memory_space<smem>>
    %c3_59 = arith.constant 3 : index
    %c7_60 = arith.constant 7 : index
    %34 = memref.load %arg2[%c3_59, %c7_60] : memref<8x9xf32, #tpu.memory_space<smem>>
    %c3_61 = arith.constant 3 : index
    %c8_62 = arith.constant 8 : index
    %35 = memref.load %arg2[%c3_61, %c8_62] : memref<8x9xf32, #tpu.memory_space<smem>>
    %c4_63 = arith.constant 4 : index
    %c0_64 = arith.constant 0 : index
    %36 = memref.load %arg2[%c4_63, %c0_64] : memref<8x9xf32, #tpu.memory_space<smem>>
    %c4_65 = arith.constant 4 : index
    %c1_66 = arith.constant 1 : index
    %37 = memref.load %arg2[%c4_65, %c1_66] : memref<8x9xf32, #tpu.memory_space<smem>>
    %c4_67 = arith.constant 4 : index
    %c2_68 = arith.constant 2 : index
    %38 = memref.load %arg2[%c4_67, %c2_68] : memref<8x9xf32, #tpu.memory_space<smem>>
    %c4_69 = arith.constant 4 : index
    %c3_70 = arith.constant 3 : index
    %39 = memref.load %arg2[%c4_69, %c3_70] : memref<8x9xf32, #tpu.memory_space<smem>>
    %c4_71 = arith.constant 4 : index
    %c4_72 = arith.constant 4 : index
    %40 = memref.load %arg2[%c4_71, %c4_72] : memref<8x9xf32, #tpu.memory_space<smem>>
    %c4_73 = arith.constant 4 : index
    %c5_74 = arith.constant 5 : index
    %41 = memref.load %arg2[%c4_73, %c5_74] : memref<8x9xf32, #tpu.memory_space<smem>>
    %c4_75 = arith.constant 4 : index
    %c6_76 = arith.constant 6 : index
    %42 = memref.load %arg2[%c4_75, %c6_76] : memref<8x9xf32, #tpu.memory_space<smem>>
    %c4_77 = arith.constant 4 : index
    %c7_78 = arith.constant 7 : index
    %43 = memref.load %arg2[%c4_77, %c7_78] : memref<8x9xf32, #tpu.memory_space<smem>>
    %c4_79 = arith.constant 4 : index
    %c8_80 = arith.constant 8 : index
    %44 = memref.load %arg2[%c4_79, %c8_80] : memref<8x9xf32, #tpu.memory_space<smem>>
    %c5_81 = arith.constant 5 : index
    %c0_82 = arith.constant 0 : index
    %45 = memref.load %arg2[%c5_81, %c0_82] : memref<8x9xf32, #tpu.memory_space<smem>>
    %c5_83 = arith.constant 5 : index
    %c1_84 = arith.constant 1 : index
    %46 = memref.load %arg2[%c5_83, %c1_84] : memref<8x9xf32, #tpu.memory_space<smem>>
    %c5_85 = arith.constant 5 : index
    %c2_86 = arith.constant 2 : index
    %47 = memref.load %arg2[%c5_85, %c2_86] : memref<8x9xf32, #tpu.memory_space<smem>>
    %c5_87 = arith.constant 5 : index
    %c3_88 = arith.constant 3 : index
    %48 = memref.load %arg2[%c5_87, %c3_88] : memref<8x9xf32, #tpu.memory_space<smem>>
    %c5_89 = arith.constant 5 : index
    %c4_90 = arith.constant 4 : index
    %49 = memref.load %arg2[%c5_89, %c4_90] : memref<8x9xf32, #tpu.memory_space<smem>>
    %c5_91 = arith.constant 5 : index
    %c5_92 = arith.constant 5 : index
    %50 = memref.load %arg2[%c5_91, %c5_92] : memref<8x9xf32, #tpu.memory_space<smem>>
    %c5_93 = arith.constant 5 : index
    %c6_94 = arith.constant 6 : index
    %51 = memref.load %arg2[%c5_93, %c6_94] : memref<8x9xf32, #tpu.memory_space<smem>>
    %c5_95 = arith.constant 5 : index
    %c7_96 = arith.constant 7 : index
    %52 = memref.load %arg2[%c5_95, %c7_96] : memref<8x9xf32, #tpu.memory_space<smem>>
    %c5_97 = arith.constant 5 : index
    %c8_98 = arith.constant 8 : index
    %53 = memref.load %arg2[%c5_97, %c8_98] : memref<8x9xf32, #tpu.memory_space<smem>>
    %c6_99 = arith.constant 6 : index
    %c0_100 = arith.constant 0 : index
    %54 = memref.load %arg2[%c6_99, %c0_100] : memref<8x9xf32, #tpu.memory_space<smem>>
    %c6_101 = arith.constant 6 : index
    %c1_102 = arith.constant 1 : index
    %55 = memref.load %arg2[%c6_101, %c1_102] : memref<8x9xf32, #tpu.memory_space<smem>>
    %c6_103 = arith.constant 6 : index
    %c2_104 = arith.constant 2 : index
    %56 = memref.load %arg2[%c6_103, %c2_104] : memref<8x9xf32, #tpu.memory_space<smem>>
    %c6_105 = arith.constant 6 : index
    %c3_106 = arith.constant 3 : index
    %57 = memref.load %arg2[%c6_105, %c3_106] : memref<8x9xf32, #tpu.memory_space<smem>>
    %c6_107 = arith.constant 6 : index
    %c4_108 = arith.constant 4 : index
    %58 = memref.load %arg2[%c6_107, %c4_108] : memref<8x9xf32, #tpu.memory_space<smem>>
    %c6_109 = arith.constant 6 : index
    %c5_110 = arith.constant 5 : index
    %59 = memref.load %arg2[%c6_109, %c5_110] : memref<8x9xf32, #tpu.memory_space<smem>>
    %c6_111 = arith.constant 6 : index
    %c6_112 = arith.constant 6 : index
    %60 = memref.load %arg2[%c6_111, %c6_112] : memref<8x9xf32, #tpu.memory_space<smem>>
    %c6_113 = arith.constant 6 : index
    %c7_114 = arith.constant 7 : index
    %61 = memref.load %arg2[%c6_113, %c7_114] : memref<8x9xf32, #tpu.memory_space<smem>>
    %c6_115 = arith.constant 6 : index
    %c8_116 = arith.constant 8 : index
    %62 = memref.load %arg2[%c6_115, %c8_116] : memref<8x9xf32, #tpu.memory_space<smem>>
    %c7_117 = arith.constant 7 : index
    %c0_118 = arith.constant 0 : index
    %63 = memref.load %arg2[%c7_117, %c0_118] : memref<8x9xf32, #tpu.memory_space<smem>>
    %c7_119 = arith.constant 7 : index
    %c1_120 = arith.constant 1 : index
    %64 = memref.load %arg2[%c7_119, %c1_120] : memref<8x9xf32, #tpu.memory_space<smem>>
    %c7_121 = arith.constant 7 : index
    %c2_122 = arith.constant 2 : index
    %65 = memref.load %arg2[%c7_121, %c2_122] : memref<8x9xf32, #tpu.memory_space<smem>>
    %c7_123 = arith.constant 7 : index
    %c3_124 = arith.constant 3 : index
    %66 = memref.load %arg2[%c7_123, %c3_124] : memref<8x9xf32, #tpu.memory_space<smem>>
    %c7_125 = arith.constant 7 : index
    %c4_126 = arith.constant 4 : index
    %67 = memref.load %arg2[%c7_125, %c4_126] : memref<8x9xf32, #tpu.memory_space<smem>>
    %c7_127 = arith.constant 7 : index
    %c5_128 = arith.constant 5 : index
    %68 = memref.load %arg2[%c7_127, %c5_128] : memref<8x9xf32, #tpu.memory_space<smem>>
    %c7_129 = arith.constant 7 : index
    %c6_130 = arith.constant 6 : index
    %69 = memref.load %arg2[%c7_129, %c6_130] : memref<8x9xf32, #tpu.memory_space<smem>>
    %c7_131 = arith.constant 7 : index
    %c7_132 = arith.constant 7 : index
    %70 = memref.load %arg2[%c7_131, %c7_132] : memref<8x9xf32, #tpu.memory_space<smem>>
    %c7_133 = arith.constant 7 : index
    %c8_134 = arith.constant 8 : index
    %71 = memref.load %arg2[%c7_133, %c8_134] : memref<8x9xf32, #tpu.memory_space<smem>>
    %c0_135 = arith.constant 0 : index
    %72 = memref.load %arg3[%c0_135] : memref<8xf32, #tpu.memory_space<smem>>
    %c1_136 = arith.constant 1 : index
    %73 = memref.load %arg3[%c1_136] : memref<8xf32, #tpu.memory_space<smem>>
    %c2_137 = arith.constant 2 : index
    %74 = memref.load %arg3[%c2_137] : memref<8xf32, #tpu.memory_space<smem>>
    %c3_138 = arith.constant 3 : index
    %75 = memref.load %arg3[%c3_138] : memref<8xf32, #tpu.memory_space<smem>>
    %c4_139 = arith.constant 4 : index
    %76 = memref.load %arg3[%c4_139] : memref<8xf32, #tpu.memory_space<smem>>
    %c5_140 = arith.constant 5 : index
    %77 = memref.load %arg3[%c5_140] : memref<8xf32, #tpu.memory_space<smem>>
    %c6_141 = arith.constant 6 : index
    %78 = memref.load %arg3[%c6_141] : memref<8xf32, #tpu.memory_space<smem>>
    %c7_142 = arith.constant 7 : index
    %79 = memref.load %arg3[%c7_142] : memref<8xf32, #tpu.memory_space<smem>>
    %80 = tpu.iota {dimensions = array<i32: 1>} : vector<8x256xi32>
    %c16_i32 = arith.constant 16 : i32
    %c0_i32 = arith.constant 0 : i32
    %81 = arith.cmpi eq, %c16_i32, %c0_i32 : i32
    %c1_i32 = arith.constant 1 : i32
    %82 = arith.select %81, %c1_i32, %c16_i32 : i32
    %83 = vector.broadcast %82 : i32 to vector<8x256xi32>
    %84 = arith.remsi %80, %83 : vector<8x256xi32>
    %c0_i32_143 = arith.constant 0 : i32
    %85 = vector.broadcast %c0_i32_143 : i32 to vector<8x256xi32>
    %86 = arith.cmpi ne, %84, %85 : vector<8x256xi32>
    %c0_i32_144 = arith.constant 0 : i32
    %87 = vector.broadcast %c0_i32_144 : i32 to vector<8x256xi32>
    %88 = arith.cmpi slt, %84, %87 : vector<8x256xi32>
    %c0_i32_145 = arith.constant 0 : i32
    %89 = arith.cmpi slt, %82, %c0_i32_145 : i32
    %90 = vector.broadcast %89 : i1 to vector<8x256xi1>
    %91 = vector.broadcast %90 : vector<8x256xi1> to vector<8x256xi1>
    %92 = arith.xori %88, %91 : vector<8x256xi1>
    %93 = arith.andi %92, %86 : vector<8x256xi1>
    %94 = vector.broadcast %82 : i32 to vector<8x256xi32>
    %95 = arith.addi %84, %94 : vector<8x256xi32>
    %96 = arith.select %93, %95, %84 : vector<8x256xi1>, vector<8x256xi32>
    %c0_i32_146 = arith.constant 0 : i32
    %97 = vector.broadcast %c0_i32_146 : i32 to vector<8x256xi32>
    %98 = arith.cmpi eq, %96, %97 : vector<8x256xi32>
    %c15_i32 = arith.constant 15 : i32
    %99 = vector.broadcast %c15_i32 : i32 to vector<8x256xi32>
    %100 = arith.cmpi eq, %96, %99 : vector<8x256xi32>
    %cst = arith.constant 0.000000e+00 : f32
    %101 = vector.broadcast %cst : f32 to vector<8x17xf32>
    %c0_i32_147 = arith.constant 0 : i32
    %c8_i32 = arith.constant 8 : i32
    %102 = arith.muli %c0_i32_147, %c8_i32 : i32
    %103 = tpu.assume_multiple %102, 8 : i32
    %104 = arith.index_cast %103 : i32 to index
    %c0_148 = arith.constant 0 : index
    %105 = vector.load %arg1[%104, %c0_148] : memref<8x256xf32, #tpu.memory_space<vmem>>, vector<8x256xf32>
    %cst_149 = arith.constant 0.000000e+00 : f32
    %106 = vector.broadcast %cst_149 : f32 to vector<8x256xf32>
    %107 = arith.select %100, %106, %105 : vector<8x256xi1>, vector<8x256xf32>
    %cst_150 = arith.constant 0.000000e+00 : f32
    %108 = vector.broadcast %cst_150 : f32 to vector<8x256xf32>
    %109 = arith.select %98, %108, %105 : vector<8x256xi1>, vector<8x256xf32>
    %110 = tpu.concatenate %101, %107, %101 in 1 : vector<8x17xf32>, vector<8x256xf32>, vector<8x17xf32> -> vector<8x290xf32>
    %111 = tpu.concatenate %101, %105, %101 in 1 : vector<8x17xf32>, vector<8x256xf32>, vector<8x17xf32> -> vector<8x290xf32>
    %112 = tpu.concatenate %101, %109, %101 in 1 : vector<8x17xf32>, vector<8x256xf32>, vector<8x17xf32> -> vector<8x290xf32>
    %113 = vector.extract_strided_slice %110 {offsets = [0, 0], sizes = [8, 256], strides = [1, 1]} : vector<8x290xf32> to vector<8x256xf32>
    %114 = vector.broadcast %0 : f32 to vector<8x256xf32>
    %115 = arith.mulf %113, %114 : vector<8x256xf32>
    %116 = vector.broadcast %9 : f32 to vector<8x256xf32>
    %117 = arith.mulf %113, %116 : vector<8x256xf32>
    %118 = vector.broadcast %18 : f32 to vector<8x256xf32>
    %119 = arith.mulf %113, %118 : vector<8x256xf32>
    %120 = vector.broadcast %27 : f32 to vector<8x256xf32>
    %121 = arith.mulf %113, %120 : vector<8x256xf32>
    %122 = vector.broadcast %36 : f32 to vector<8x256xf32>
    %123 = arith.mulf %113, %122 : vector<8x256xf32>
    %124 = vector.broadcast %45 : f32 to vector<8x256xf32>
    %125 = arith.mulf %113, %124 : vector<8x256xf32>
    %126 = vector.broadcast %54 : f32 to vector<8x256xf32>
    %127 = arith.mulf %113, %126 : vector<8x256xf32>
    %128 = vector.broadcast %63 : f32 to vector<8x256xf32>
    %129 = arith.mulf %113, %128 : vector<8x256xf32>
    %130 = vector.extract_strided_slice %111 {offsets = [0, 1], sizes = [8, 256], strides = [1, 1]} : vector<8x290xf32> to vector<8x256xf32>
    %131 = vector.broadcast %1 : f32 to vector<8x256xf32>
    %132 = arith.mulf %130, %131 : vector<8x256xf32>
    %133 = arith.addf %115, %132 : vector<8x256xf32>
    %134 = vector.broadcast %10 : f32 to vector<8x256xf32>
    %135 = arith.mulf %130, %134 : vector<8x256xf32>
    %136 = arith.addf %117, %135 : vector<8x256xf32>
    %137 = vector.broadcast %19 : f32 to vector<8x256xf32>
    %138 = arith.mulf %130, %137 : vector<8x256xf32>
    %139 = arith.addf %119, %138 : vector<8x256xf32>
    %140 = vector.broadcast %28 : f32 to vector<8x256xf32>
    %141 = arith.mulf %130, %140 : vector<8x256xf32>
    %142 = arith.addf %121, %141 : vector<8x256xf32>
    %143 = vector.broadcast %37 : f32 to vector<8x256xf32>
    %144 = arith.mulf %130, %143 : vector<8x256xf32>
    %145 = arith.addf %123, %144 : vector<8x256xf32>
    %146 = vector.broadcast %46 : f32 to vector<8x256xf32>
    %147 = arith.mulf %130, %146 : vector<8x256xf32>
    %148 = arith.addf %125, %147 : vector<8x256xf32>
    %149 = vector.broadcast %55 : f32 to vector<8x256xf32>
    %150 = arith.mulf %130, %149 : vector<8x256xf32>
    %151 = arith.addf %127, %150 : vector<8x256xf32>
    %152 = vector.broadcast %64 : f32 to vector<8x256xf32>
    %153 = arith.mulf %130, %152 : vector<8x256xf32>
    %154 = arith.addf %129, %153 : vector<8x256xf32>
    %155 = vector.extract_strided_slice %112 {offsets = [0, 2], sizes = [8, 256], strides = [1, 1]} : vector<8x290xf32> to vector<8x256xf32>
    %156 = vector.broadcast %2 : f32 to vector<8x256xf32>
    %157 = arith.mulf %155, %156 : vector<8x256xf32>
    %158 = arith.addf %133, %157 : vector<8x256xf32>
    %159 = vector.broadcast %11 : f32 to vector<8x256xf32>
    %160 = arith.mulf %155, %159 : vector<8x256xf32>
    %161 = arith.addf %136, %160 : vector<8x256xf32>
    %162 = vector.broadcast %20 : f32 to vector<8x256xf32>
    %163 = arith.mulf %155, %162 : vector<8x256xf32>
    %164 = arith.addf %139, %163 : vector<8x256xf32>
    %165 = vector.broadcast %29 : f32 to vector<8x256xf32>
    %166 = arith.mulf %155, %165 : vector<8x256xf32>
    %167 = arith.addf %142, %166 : vector<8x256xf32>
    %168 = vector.broadcast %38 : f32 to vector<8x256xf32>
    %169 = arith.mulf %155, %168 : vector<8x256xf32>
    %170 = arith.addf %145, %169 : vector<8x256xf32>
    %171 = vector.broadcast %47 : f32 to vector<8x256xf32>
    %172 = arith.mulf %155, %171 : vector<8x256xf32>
    %173 = arith.addf %148, %172 : vector<8x256xf32>
    %174 = vector.broadcast %56 : f32 to vector<8x256xf32>
    %175 = arith.mulf %155, %174 : vector<8x256xf32>
    %176 = arith.addf %151, %175 : vector<8x256xf32>
    %177 = vector.broadcast %65 : f32 to vector<8x256xf32>
    %178 = arith.mulf %155, %177 : vector<8x256xf32>
    %179 = arith.addf %154, %178 : vector<8x256xf32>
    %180 = vector.extract_strided_slice %110 {offsets = [0, 16], sizes = [8, 256], strides = [1, 1]} : vector<8x290xf32> to vector<8x256xf32>
    %181 = vector.broadcast %3 : f32 to vector<8x256xf32>
    %182 = arith.mulf %180, %181 : vector<8x256xf32>
    %183 = arith.addf %158, %182 : vector<8x256xf32>
    %184 = vector.broadcast %12 : f32 to vector<8x256xf32>
    %185 = arith.mulf %180, %184 : vector<8x256xf32>
    %186 = arith.addf %161, %185 : vector<8x256xf32>
    %187 = vector.broadcast %21 : f32 to vector<8x256xf32>
    %188 = arith.mulf %180, %187 : vector<8x256xf32>
    %189 = arith.addf %164, %188 : vector<8x256xf32>
    %190 = vector.broadcast %30 : f32 to vector<8x256xf32>
    %191 = arith.mulf %180, %190 : vector<8x256xf32>
    %192 = arith.addf %167, %191 : vector<8x256xf32>
    %193 = vector.broadcast %39 : f32 to vector<8x256xf32>
    %194 = arith.mulf %180, %193 : vector<8x256xf32>
    %195 = arith.addf %170, %194 : vector<8x256xf32>
    %196 = vector.broadcast %48 : f32 to vector<8x256xf32>
    %197 = arith.mulf %180, %196 : vector<8x256xf32>
    %198 = arith.addf %173, %197 : vector<8x256xf32>
    %199 = vector.broadcast %57 : f32 to vector<8x256xf32>
    %200 = arith.mulf %180, %199 : vector<8x256xf32>
    %201 = arith.addf %176, %200 : vector<8x256xf32>
    %202 = vector.broadcast %66 : f32 to vector<8x256xf32>
    %203 = arith.mulf %180, %202 : vector<8x256xf32>
    %204 = arith.addf %179, %203 : vector<8x256xf32>
    %205 = vector.extract_strided_slice %111 {offsets = [0, 17], sizes = [8, 256], strides = [1, 1]} : vector<8x290xf32> to vector<8x256xf32>
    %206 = vector.broadcast %4 : f32 to vector<8x256xf32>
    %207 = arith.mulf %205, %206 : vector<8x256xf32>
    %208 = arith.addf %183, %207 : vector<8x256xf32>
    %209 = vector.broadcast %13 : f32 to vector<8x256xf32>
    %210 = arith.mulf %205, %209 : vector<8x256xf32>
    %211 = arith.addf %186, %210 : vector<8x256xf32>
    %212 = vector.broadcast %22 : f32 to vector<8x256xf32>
    %213 = arith.mulf %205, %212 : vector<8x256xf32>
    %214 = arith.addf %189, %213 : vector<8x256xf32>
    %215 = vector.broadcast %31 : f32 to vector<8x256xf32>
    %216 = arith.mulf %205, %215 : vector<8x256xf32>
    %217 = arith.addf %192, %216 : vector<8x256xf32>
    %218 = vector.broadcast %40 : f32 to vector<8x256xf32>
    %219 = arith.mulf %205, %218 : vector<8x256xf32>
    %220 = arith.addf %195, %219 : vector<8x256xf32>
    %221 = vector.broadcast %49 : f32 to vector<8x256xf32>
    %222 = arith.mulf %205, %221 : vector<8x256xf32>
    %223 = arith.addf %198, %222 : vector<8x256xf32>
    %224 = vector.broadcast %58 : f32 to vector<8x256xf32>
    %225 = arith.mulf %205, %224 : vector<8x256xf32>
    %226 = arith.addf %201, %225 : vector<8x256xf32>
    %227 = vector.broadcast %67 : f32 to vector<8x256xf32>
    %228 = arith.mulf %205, %227 : vector<8x256xf32>
    %229 = arith.addf %204, %228 : vector<8x256xf32>
    %230 = vector.extract_strided_slice %112 {offsets = [0, 18], sizes = [8, 256], strides = [1, 1]} : vector<8x290xf32> to vector<8x256xf32>
    %231 = vector.broadcast %5 : f32 to vector<8x256xf32>
    %232 = arith.mulf %230, %231 : vector<8x256xf32>
    %233 = arith.addf %208, %232 : vector<8x256xf32>
    %234 = vector.broadcast %14 : f32 to vector<8x256xf32>
    %235 = arith.mulf %230, %234 : vector<8x256xf32>
    %236 = arith.addf %211, %235 : vector<8x256xf32>
    %237 = vector.broadcast %23 : f32 to vector<8x256xf32>
    %238 = arith.mulf %230, %237 : vector<8x256xf32>
    %239 = arith.addf %214, %238 : vector<8x256xf32>
    %240 = vector.broadcast %32 : f32 to vector<8x256xf32>
    %241 = arith.mulf %230, %240 : vector<8x256xf32>
    %242 = arith.addf %217, %241 : vector<8x256xf32>
    %243 = vector.broadcast %41 : f32 to vector<8x256xf32>
    %244 = arith.mulf %230, %243 : vector<8x256xf32>
    %245 = arith.addf %220, %244 : vector<8x256xf32>
    %246 = vector.broadcast %50 : f32 to vector<8x256xf32>
    %247 = arith.mulf %230, %246 : vector<8x256xf32>
    %248 = arith.addf %223, %247 : vector<8x256xf32>
    %249 = vector.broadcast %59 : f32 to vector<8x256xf32>
    %250 = arith.mulf %230, %249 : vector<8x256xf32>
    %251 = arith.addf %226, %250 : vector<8x256xf32>
    %252 = vector.broadcast %68 : f32 to vector<8x256xf32>
    %253 = arith.mulf %230, %252 : vector<8x256xf32>
    %254 = arith.addf %229, %253 : vector<8x256xf32>
    %255 = vector.extract_strided_slice %110 {offsets = [0, 32], sizes = [8, 256], strides = [1, 1]} : vector<8x290xf32> to vector<8x256xf32>
    %256 = vector.broadcast %6 : f32 to vector<8x256xf32>
    %257 = arith.mulf %255, %256 : vector<8x256xf32>
    %258 = arith.addf %233, %257 : vector<8x256xf32>
    %259 = vector.broadcast %15 : f32 to vector<8x256xf32>
    %260 = arith.mulf %255, %259 : vector<8x256xf32>
    %261 = arith.addf %236, %260 : vector<8x256xf32>
    %262 = vector.broadcast %24 : f32 to vector<8x256xf32>
    %263 = arith.mulf %255, %262 : vector<8x256xf32>
    %264 = arith.addf %239, %263 : vector<8x256xf32>
    %265 = vector.broadcast %33 : f32 to vector<8x256xf32>
    %266 = arith.mulf %255, %265 : vector<8x256xf32>
    %267 = arith.addf %242, %266 : vector<8x256xf32>
    %268 = vector.broadcast %42 : f32 to vector<8x256xf32>
    %269 = arith.mulf %255, %268 : vector<8x256xf32>
    %270 = arith.addf %245, %269 : vector<8x256xf32>
    %271 = vector.broadcast %51 : f32 to vector<8x256xf32>
    %272 = arith.mulf %255, %271 : vector<8x256xf32>
    %273 = arith.addf %248, %272 : vector<8x256xf32>
    %274 = vector.broadcast %60 : f32 to vector<8x256xf32>
    %275 = arith.mulf %255, %274 : vector<8x256xf32>
    %276 = arith.addf %251, %275 : vector<8x256xf32>
    %277 = vector.broadcast %69 : f32 to vector<8x256xf32>
    %278 = arith.mulf %255, %277 : vector<8x256xf32>
    %279 = arith.addf %254, %278 : vector<8x256xf32>
    %280 = vector.extract_strided_slice %111 {offsets = [0, 33], sizes = [8, 256], strides = [1, 1]} : vector<8x290xf32> to vector<8x256xf32>
    %281 = vector.broadcast %7 : f32 to vector<8x256xf32>
    %282 = arith.mulf %280, %281 : vector<8x256xf32>
    %283 = arith.addf %258, %282 : vector<8x256xf32>
    %284 = vector.broadcast %16 : f32 to vector<8x256xf32>
    %285 = arith.mulf %280, %284 : vector<8x256xf32>
    %286 = arith.addf %261, %285 : vector<8x256xf32>
    %287 = vector.broadcast %25 : f32 to vector<8x256xf32>
    %288 = arith.mulf %280, %287 : vector<8x256xf32>
    %289 = arith.addf %264, %288 : vector<8x256xf32>
    %290 = vector.broadcast %34 : f32 to vector<8x256xf32>
    %291 = arith.mulf %280, %290 : vector<8x256xf32>
    %292 = arith.addf %267, %291 : vector<8x256xf32>
    %293 = vector.broadcast %43 : f32 to vector<8x256xf32>
    %294 = arith.mulf %280, %293 : vector<8x256xf32>
    %295 = arith.addf %270, %294 : vector<8x256xf32>
    %296 = vector.broadcast %52 : f32 to vector<8x256xf32>
    %297 = arith.mulf %280, %296 : vector<8x256xf32>
    %298 = arith.addf %273, %297 : vector<8x256xf32>
    %299 = vector.broadcast %61 : f32 to vector<8x256xf32>
    %300 = arith.mulf %280, %299 : vector<8x256xf32>
    %301 = arith.addf %276, %300 : vector<8x256xf32>
    %302 = vector.broadcast %70 : f32 to vector<8x256xf32>
    %303 = arith.mulf %280, %302 : vector<8x256xf32>
    %304 = arith.addf %279, %303 : vector<8x256xf32>
    %305 = vector.extract_strided_slice %112 {offsets = [0, 34], sizes = [8, 256], strides = [1, 1]} : vector<8x290xf32> to vector<8x256xf32>
    %306 = vector.broadcast %8 : f32 to vector<8x256xf32>
    %307 = arith.mulf %305, %306 : vector<8x256xf32>
    %308 = arith.addf %283, %307 : vector<8x256xf32>
    %309 = vector.broadcast %17 : f32 to vector<8x256xf32>
    %310 = arith.mulf %305, %309 : vector<8x256xf32>
    %311 = arith.addf %286, %310 : vector<8x256xf32>
    %312 = vector.broadcast %26 : f32 to vector<8x256xf32>
    %313 = arith.mulf %305, %312 : vector<8x256xf32>
    %314 = arith.addf %289, %313 : vector<8x256xf32>
    %315 = vector.broadcast %35 : f32 to vector<8x256xf32>
    %316 = arith.mulf %305, %315 : vector<8x256xf32>
    %317 = arith.addf %292, %316 : vector<8x256xf32>
    %318 = vector.broadcast %44 : f32 to vector<8x256xf32>
    %319 = arith.mulf %305, %318 : vector<8x256xf32>
    %320 = arith.addf %295, %319 : vector<8x256xf32>
    %321 = vector.broadcast %53 : f32 to vector<8x256xf32>
    %322 = arith.mulf %305, %321 : vector<8x256xf32>
    %323 = arith.addf %298, %322 : vector<8x256xf32>
    %324 = vector.broadcast %62 : f32 to vector<8x256xf32>
    %325 = arith.mulf %305, %324 : vector<8x256xf32>
    %326 = arith.addf %301, %325 : vector<8x256xf32>
    %327 = vector.broadcast %71 : f32 to vector<8x256xf32>
    %328 = arith.mulf %305, %327 : vector<8x256xf32>
    %329 = arith.addf %304, %328 : vector<8x256xf32>
    %330 = vector.broadcast %72 : f32 to vector<8x256xf32>
    %331 = arith.addf %308, %330 : vector<8x256xf32>
    %332 = arith.index_cast %103 : i32 to index
    %c0_151 = arith.constant 0 : index
    %333 = vector.load %arg4[%332, %c0_151] : memref<8x2048xf32, #tpu.memory_space<vmem>>, vector<8x256xf32>
    tpu.vector_store %arg4[%332, %c0_151], %331 {strides = array<i32>} : memref<8x2048xf32, #tpu.memory_space<vmem>>, vector<8x256xf32>,
    %334 = vector.broadcast %73 : f32 to vector<8x256xf32>
    %335 = arith.addf %311, %334 : vector<8x256xf32>
    %336 = arith.index_cast %103 : i32 to index
    %c256 = arith.constant 256 : index
    %337 = vector.load %arg4[%336, %c256] : memref<8x2048xf32, #tpu.memory_space<vmem>>, vector<8x256xf32>
    tpu.vector_store %arg4[%336, %c256], %335 {strides = array<i32>} : memref<8x2048xf32, #tpu.memory_space<vmem>>, vector<8x256xf32>,
    %338 = vector.broadcast %74 : f32 to vector<8x256xf32>
    %339 = arith.addf %314, %338 : vector<8x256xf32>
    %340 = arith.index_cast %103 : i32 to index
    %c512 = arith.constant 512 : index
    %341 = vector.load %arg4[%340, %c512] : memref<8x2048xf32, #tpu.memory_space<vmem>>, vector<8x256xf32>
    tpu.vector_store %arg4[%340, %c512], %339 {strides = array<i32>} : memref<8x2048xf32, #tpu.memory_space<vmem>>, vector<8x256xf32>,
    %342 = vector.broadcast %75 : f32 to vector<8x256xf32>
    %343 = arith.addf %317, %342 : vector<8x256xf32>
    %344 = arith.index_cast %103 : i32 to index
    %c768 = arith.constant 768 : index
    %345 = vector.load %arg4[%344, %c768] : memref<8x2048xf32, #tpu.memory_space<vmem>>, vector<8x256xf32>
    tpu.vector_store %arg4[%344, %c768], %343 {strides = array<i32>} : memref<8x2048xf32, #tpu.memory_space<vmem>>, vector<8x256xf32>,
    %346 = vector.broadcast %76 : f32 to vector<8x256xf32>
    %347 = arith.addf %320, %346 : vector<8x256xf32>
    %348 = arith.index_cast %103 : i32 to index
    %c1024 = arith.constant 1024 : index
    %349 = vector.load %arg4[%348, %c1024] : memref<8x2048xf32, #tpu.memory_space<vmem>>, vector<8x256xf32>
    tpu.vector_store %arg4[%348, %c1024], %347 {strides = array<i32>} : memref<8x2048xf32, #tpu.memory_space<vmem>>, vector<8x256xf32>,
    %350 = vector.broadcast %77 : f32 to vector<8x256xf32>
    %351 = arith.addf %323, %350 : vector<8x256xf32>
    %352 = arith.index_cast %103 : i32 to index
    %c1280 = arith.constant 1280 : index
    %353 = vector.load %arg4[%352, %c1280] : memref<8x2048xf32, #tpu.memory_space<vmem>>, vector<8x256xf32>
    tpu.vector_store %arg4[%352, %c1280], %351 {strides = array<i32>} : memref<8x2048xf32, #tpu.memory_space<vmem>>, vector<8x256xf32>,
    %354 = vector.broadcast %78 : f32 to vector<8x256xf32>
    %355 = arith.addf %326, %354 : vector<8x256xf32>
    %356 = arith.index_cast %103 : i32 to index
    %c1536 = arith.constant 1536 : index
    %357 = vector.load %arg4[%356, %c1536] : memref<8x2048xf32, #tpu.memory_space<vmem>>, vector<8x256xf32>
    tpu.vector_store %arg4[%356, %c1536], %355 {strides = array<i32>} : memref<8x2048xf32, #tpu.memory_space<vmem>>, vector<8x256xf32>,
    %358 = vector.broadcast %79 : f32 to vector<8x256xf32>
    %359 = arith.addf %329, %358 : vector<8x256xf32>
    %360 = arith.index_cast %103 : i32 to index
    %c1792 = arith.constant 1792 : index
    %361 = vector.load %arg4[%360, %c1792] : memref<8x2048xf32, #tpu.memory_space<vmem>>, vector<8x256xf32>
    tpu.vector_store %arg4[%360, %c1792], %359 {strides = array<i32>} : memref<8x2048xf32, #tpu.memory_space<vmem>>, vector<8x256xf32>,
    %c1_i32_152 = arith.constant 1 : i32
    return
  }
  func.func @transform_0(%arg0: i32) -> (i32, i32) {
    %c0_i32 = arith.constant 0 : i32
    %c0_i32_0 = arith.constant 0 : i32
    return %arg0, %c0_i32 : i32, i32
  }
  func.func @transform_1(%arg0: i32) -> (i32, i32) {
    %c0_i32 = arith.constant 0 : i32
    %c0_i32_0 = arith.constant 0 : i32
    %c0_i32_1 = arith.constant 0 : i32
    return %c0_i32, %c0_i32_0 : i32, i32
  }
  func.func @transform_2(%arg0: i32) -> i32 {
    %c0_i32 = arith.constant 0 : i32
    %c0_i32_0 = arith.constant 0 : i32
    return %c0_i32 : i32
  }
  func.func @transform_3(%arg0: i32) -> (i32, i32) {
    %c0_i32 = arith.constant 0 : i32
    %c0_i32_0 = arith.constant 0 : i32
    return %arg0, %c0_i32 : i32, i32
  }
}

</mosaic_0001>

<bundles_post_ra>
// kernel: tpu_custom_call.1
= control target key start
LH: loop header
LB: loop body
LE: loop exit
PB: predicated region body
PF: predicated region fallthrough
CT: control target
= control target key end

     0   :  { %8 = vsyncpa [#allocation3], 0  ;;  %s2744_s0 = inlined_call_operand.hbm [shape: f32[8,256], index: 0, kind: input, shape index: {}]   ;;  %s2745_s1 = inlined_call_operand.hbm [shape: f32[8,9], index: 1, kind: input, shape index: {}]   ;;  %s2746_s2 = inlined_call_operand.vmem [shape: f32[8], index: 2, kind: input, shape index: {}]   ;;  %s2747_s3 = inlined_call_operand.hbm [shape: f32[8,2048], index: 3, kind: output, shape index: {}]  }
   0x1   :  { %9 = vsyncpa [#allocation5], 0 }
   0x2   :  { %10 = vsyncpa [#allocation6], 0 }
   0x3   :  { %11 = vsyncpa [#allocation4], 0  ;;  %s17_s14 = sshll.u32 %s2744_s0, 4  ;;  %s1692_s15 = smov [#allocation2]   ;;  %s18_s14 = int_to_ptr.hbm [resolvable:$true] %s17_s14 }
   0x4   :  { %s19_s16 = sshll.u32 %s1692_s15, 4  ;;  %s28_s19 = sshll.u32 %s2745_s1, 4  ;;  %s20_s16 = int_to_ptr.vmem [resolvable:$true] %s19_s16  ;;  %s29_s19 = int_to_ptr.hbm [resolvable:$true] %s28_s19 }
   0x5   :  { %22 = dma.hbm_to_vmem [thread:$0]  %s18_s14, 256, %s20_s16, [#allocation3]  }
   0x6   :  { %s1693_s20 = smov [#allocation7]   ;;  %s37_s23 = sshll.u32 %s2746_s2, 4  ;;  %s38_s23 = int_to_ptr.vmem [resolvable:$true] %s37_s23 }
   0x7   :  { %31 = dma.hbm_to_smem %s29_s19, 128, %s1693_s20, [#allocation5]  }
   0x8   :  { %s1694_s24 = smov [#allocation8]  }
   0x9   :  { %40 = dma.vmem_to_smem %s38_s23, 16, %s1694_s24, [#allocation6]  }
   0xa   :  { %1684 = dma.done.wait [#allocation3], 256  }
   0xb   :  { %1685 = vsyncadd [#allocation3], 4294967040 }
   0xc   :  { %1686 = dma.done.wait [#allocation5], 128  }
   0xd   :  { %1687 = vsyncadd [#allocation5], 4294967168 }
   0xe   :  { %1688 = dma.done.wait [#allocation6], 16  }
   0xf   :  { %1689 = vsyncadd [#allocation6], 4294967280 }
  0x10   :  { %53 = sfence }
  0x11   :  { %v168_v0 = vld [vmem:[#allocation2] sm:$0xff]  ;;  %v134_v1 = vlaneseq  ;;  %s1695_s0 = smov 17   ;;  %v169_v5 = vld [vmem:[#allocation2 + $0x8] sm:$0xff]  ;;  %s1521_s1 = sld [smem:[#allocation7 + $0x1]]  ;;  %vm180_vm4 = vcmask 138240   ;;  %vm248_vm5 = vcmask 1039360  }
  0x12   :  { %189 = vrot.lane.b32.xlu1 %v168_v0, %s1695_s0  ;;  %s1530_s2 = sld [smem:[#allocation7 + $0x81]]  ;;  %s1696_s25 = smov 127   ;;  %vm401_vm6 = vcmask 1031168   ;;  %vm554_vm7 = vcmask 916480   ;;  %vm707_vm8 = vcmask 908288   ;;  %vm860_vm9 = vcmask 900096  }
  0x13   :  { %v135_v2 = vand.u32 127, %v134_v1  ;;  %s1539_s26 = sld [smem:[#allocation7 + $0x101]]  ;;  %s1697_s7 = smov 126   ;;  %vm1013_vm10 = vcmask 785408   ;;  %vm1166_vm11 = vcmask 777216   ;;  %vm1319_vm12 = vcmask 769024  }
  0x14   :  { %s1548_s27 = sld [smem:[#allocation7 + $0x181]]  ;;  %s1698_s16 = smov 112  }
  0x15   :  { %v141_v3 = vand.u32 15, %v135_v2  ;;  %v136_v4 = vadd.s32 128, %v135_v2  ;;  %s1557_s28 = sld [smem:[#allocation7 + $0x201]] }
  0x16   :  { %s1566_s29 = sld [smem:[#allocation7 + $0x281]] }
  0x17   :  { %vm161_vm0 = vcmp.eq.s32.totalorder %v141_v3, 0  ;;  %v148_v6 = vand.u32 15, %v136_v4  ;;  %vm163_vm1 = vcmp.eq.s32.totalorder %v141_v3, 15  ;;  %v235_v11 = vstv %s1521_s1  ;;  %s1575_s30 = sld [smem:[#allocation7 + $0x301]] }
  0x18   :  { %v172_v7 = vsel %vm161_vm0, 0.0, %v168_v0  ;;  %v170_v8 = vsel %vm163_vm1, 0.0, %v168_v0  ;;  %v255_v16 = vstv %s1530_s2  ;;  %s1584_s4 = sld [smem:[#allocation7 + $0x381]] }
  0x19   :  { %201 = vrot.lane.b32.xlu2 %v172_v7, %s1695_s0  ;;  %176 = vrot.lane.b32.xlu0 %v170_v8, %s1695_s0  ;;  %vm162_vm2 = vcmp.eq.s32.totalorder %v148_v6, 0  ;;  %vm164_vm3 = vcmp.eq.s32.totalorder %v148_v6, 15  ;;  %v274_v22 = vstv %s1539_s26  ;;  %s1522_s5 = sld [smem:[#allocation7 + $0x2]] }
  0x1a   :  { %191 = vrot.lane.b32.xlu1 %v169_v5, %s1695_s0  ;;  %v173_v9 = vsel %vm162_vm2, 0.0, %v169_v5  ;;  %v171_v10 = vsel %vm164_vm3, 0.0, %v169_v5  ;;  %v293_v26 = vstv %s1548_s27  ;;  %s1531_s6 = sld [smem:[#allocation7 + $0x82]] }
  0x1b   :  { %v312_v30 = vstv %s1557_s28  ;;  %s1540_s8 = sld [smem:[#allocation7 + $0x102]] }
  0x1c   :  { %v331_v34 = vstv %s1566_s29  ;;  %s1549_s9 = sld [smem:[#allocation7 + $0x182]] }
  0x1d   :  { %v350_v38 = vstv %s1575_s30  ;;  %s1558_s10 = sld [smem:[#allocation7 + $0x202]] }
  0x1e   :  { %v369_v42 = vstv %s1584_s4  ;;  %s1567_s11 = sld [smem:[#allocation7 + $0x282]] }
  0x1f   :  { %v388_v48 = vstv %s1522_s5  ;;  %s1576_s12 = sld [smem:[#allocation7 + $0x302]] }
  0x20   :  { %v408_v56 = vstv %s1531_s6  ;;  %s1585_s13 = sld [smem:[#allocation7 + $0x382]] }
  0x21   :  { %203 = vrot.lane.b32.xlu2 %v173_v9, %s1695_s0  ;;  %178 = vrot.lane.b32.xlu0 %v171_v10, %s1695_s0  ;;  %v427_v59 = vstv %s1540_s8  ;;  %s1523_s14 = sld [smem:[#allocation7 + $0x3]]  ;;  %s1699_s0 = smov 111  }
  0x22   :  { %v446_v63 = vstv %s1549_s9  ;;  %s1532_s15 = sld [smem:[#allocation7 + $0x83]]  ;;  %s1700_s8 = smov 110  }
  0x23   :  { %v465_v3 = vstv %s1558_s10  ;;  %s1541_s17 = sld [smem:[#allocation7 + $0x103]] }
  0x24   :  { %v484_v9 = vstv %s1567_s11  ;;  %s1550_s18 = sld [smem:[#allocation7 + $0x183]] }
  0x25   :  { %s1559_s19 = sld [smem:[#allocation7 + $0x203]] }
  0x26   :  { %s1568_s20 = sld [smem:[#allocation7 + $0x283]] }
  0x27   :  { %s1577_s21 = sld [smem:[#allocation7 + $0x303]] }
  0x28   :  { %s1586_s22 = sld [smem:[#allocation7 + $0x383]] }
  0x29   :  { %s1524_s23 = sld [smem:[#allocation7 + $0x4]] }
  0x2a   :  { %s1533_s24 = sld [smem:[#allocation7 + $0x84]] }
  0x2b   :  { %s1542_s1 = sld [smem:[#allocation7 + $0x104]] }
  0x2c   :  { %s1551_s2 = sld [smem:[#allocation7 + $0x184]] }
  0x2d   :  { %s1569_s26 = sld [smem:[#allocation7 + $0x284]] }
  0x2e   :  { %s1578_s27 = sld [smem:[#allocation7 + $0x304]] }
  0x2f   :  { %s1583_s28 = sld [smem:[#allocation7 + $0x380]] }
  0x30   :  { %s2031_s29 = sld [smem:[#allocation7]] }
  0x31   :  { %s1587_s30 = sld [smem:[#allocation7 + $0x384]] }
  0x32   :  { %s2050_s4 = sld [smem:[#allocation7 + $0x80]] }
  0x33   :  { %s1525_s5 = sld [smem:[#allocation7 + $0x5]] }
  0x34   :  { %s2081_s6 = sld [smem:[#allocation7 + $0x100]] }
  0x35   :  { %s2113_s9 = sld [smem:[#allocation7 + $0x180]] }
  0x36   :  { %s1543_s10 = sld [smem:[#allocation7 + $0x105]] }
  0x37   :  { %s2145_s11 = sld [smem:[#allocation7 + $0x200]] }
  0x73   :  { %v202_v43 = vpop.permute.xlu2 %201 }
  0x74   :  { %v1788_v47 = vsel %vm180_vm4, 0.0, %v202_v43 }
  0x75   :  { %v389_v49 = vmul.f32 %v388_v48, %v1788_v47  ;;  %v409_v58 = vmul.f32 %v408_v56, %v1788_v47  ;;  %v428_v62 = vmul.f32 %v427_v59, %v1788_v47  ;;  %v447_v2 = vmul.f32 %v446_v63, %v1788_v47 }
  0x76   :  { %v466_v7 = vmul.f32 %v465_v3, %v1788_v47 }
  0x7b   :  { %v204_v52 = vpop.permute.xlu2 %203 }
  0x7c   :  { %v1796_v53 = vsel %vm180_vm4, %v204_v52, 0.0  ;;  %v1800_v54 = vsel %vm180_vm4, %v202_v43, %v204_v52 }
  0x7d   :  { %v391_v55 = vmul.f32 %v388_v48, %v1796_v53  ;;  %v390_v57 = vmul.f32 %v388_v48, %v1800_v54  ;;  %v411_v60 = vmul.f32 %v408_v56, %v1796_v53  ;;  %v410_v61 = vmul.f32 %v408_v56, %v1800_v54 }
  0x7e   :  { %v430_v0 = vmul.f32 %v427_v59, %v1796_v53  ;;  %v429_v1 = vmul.f32 %v427_v59, %v1800_v54  ;;  %v449_v4 = vmul.f32 %v446_v63, %v1796_v53  ;;  %v448_v5 = vmul.f32 %v446_v63, %v1800_v54 }
  0x7f   :  { %v468_v10 = vmul.f32 %v465_v3, %v1796_v53 }
  0x84   :  { %v190_v12 = vpop.permute.xlu1 %189 }
  0x85   :  { %v1735_v13 = vsel %vm180_vm4, 0.0, %v190_v12 }
  0x86   :  { %v236_v14 = vmul.f32 %v235_v11, %v1735_v13  ;;  %v256_v21 = vmul.f32 %v255_v16, %v1735_v13  ;;  %v275_v25 = vmul.f32 %v274_v22, %v1735_v13  ;;  %v294_v29 = vmul.f32 %v293_v26, %v1735_v13 }
  0x87   :  { %v313_v33 = vmul.f32 %v312_v30, %v1735_v13  ;;  %v332_v37 = vmul.f32 %v331_v34, %v1735_v13  ;;  %v351_v41 = vmul.f32 %v350_v38, %v1735_v13  ;;  %v370_v46 = vmul.f32 %v369_v42, %v1735_v13 }
  0x88   :  { %242 = vrot.lane.b32.xlu0 %v236_v14, %s1696_s25 }
  0x8b   :  { %v177_v6 = vpop.permute.xlu0 %176 }
  0x8c   :  { %v192_v15 = vpop.permute.xlu1 %191 }
  0x8d   :  { %v1740_v17 = vsel %vm180_vm4, %v190_v12, %v192_v15  ;;  %v1743_v18 = vsel %vm180_vm4, %v192_v15, 0.0  ;;  %v485_v12 = vmul.f32 %v484_v9, %v1788_v47 }
  0x8e   :  { %v238_v19 = vmul.f32 %v235_v11, %v1743_v18  ;;  %v237_v20 = vmul.f32 %v235_v11, %v1740_v17  ;;  %v258_v23 = vmul.f32 %v255_v16, %v1743_v18  ;;  %v257_v24 = vmul.f32 %v255_v16, %v1740_v17 }
  0x8f   :  { %v277_v27 = vmul.f32 %v274_v22, %v1743_v18  ;;  %v276_v28 = vmul.f32 %v274_v22, %v1740_v17  ;;  %v296_v31 = vmul.f32 %v293_v26, %v1743_v18  ;;  %v295_v32 = vmul.f32 %v293_v26, %v1740_v17 }
  0x90   :  { %246 = vrot.lane.b32.xlu2 %v238_v19, %s1696_s25  ;;  %244 = vrot.lane.b32.xlu1 %v237_v20, %s1696_s25  ;;  %v315_v35 = vmul.f32 %v312_v30, %v1743_v18  ;;  %v314_v36 = vmul.f32 %v312_v30, %v1740_v17  ;;  %v334_v39 = vmul.f32 %v331_v34, %v1743_v18  ;;  %v503_v16 = vstv %s1576_s12  ;;  %s1552_s12 = sld [smem:[#allocation7 + $0x185]] }
  0x91   :  { %262 = vrot.lane.b32.xlu0 %v256_v21, %s1696_s25  ;;  %v333_v40 = vmul.f32 %v331_v34, %v1740_v17  ;;  %v353_v44 = vmul.f32 %v350_v38, %v1743_v18  ;;  %v352_v45 = vmul.f32 %v350_v38, %v1740_v17  ;;  %v372_v50 = vmul.f32 %v369_v42, %v1743_v18 }
  0x92   :  { %v371_v51 = vmul.f32 %v369_v42, %v1740_v17  ;;  %v467_v11 = vmul.f32 %v465_v3, %v1800_v54  ;;  %v487_v19 = vmul.f32 %v484_v9, %v1796_v53  ;;  %v486_v20 = vmul.f32 %v484_v9, %v1800_v54 }
  0x93   :  { %v179_v14 = vpop.permute.xlu0 %178  ;;  %v504_v21 = vmul.f32 %v503_v16, %v1788_v47  ;;  %v505_v26 = vmul.f32 %v503_v16, %v1800_v54  ;;  %v637_v9 = vstv %s1568_s20  ;;  %s1535_s20 = sld [smem:[#allocation7 + $0x86]] }
  0x94   :  { %v1872_v38 = vsel %vm180_vm4, %v177_v6, %v179_v14 }
  0x98   :  { %266 = vrot.lane.b32.xlu2 %v258_v23, %s1696_s25  ;;  %264 = vrot.lane.b32.xlu1 %v257_v24, %s1696_s25  ;;  %v522_v24 = vstv %s1585_s13  ;;  %s2177_s13 = sld [smem:[#allocation7 + $0x280]] }
  0x99   :  { %281 = vrot.lane.b32.xlu0 %v275_v25, %s1696_s25  ;;  %v506_v25 = vmul.f32 %v503_v16, %v1796_v53  ;;  %v524_v34 = vmul.f32 %v522_v24, %v1800_v54 }
  0xa0   :  { %285 = vrot.lane.b32.xlu2 %v277_v27, %s1696_s25  ;;  %283 = vrot.lane.b32.xlu1 %v276_v28, %s1696_s25  ;;  %v523_v27 = vmul.f32 %v522_v24, %v1788_v47 }
  0xa1   :  { %300 = vrot.lane.b32.xlu0 %v294_v29, %s1696_s25 }
  0xa8   :  { %304 = vrot.lane.b32.xlu2 %v296_v31, %s1696_s25  ;;  %302 = vrot.lane.b32.xlu1 %v295_v32, %s1696_s25  ;;  %v1859_v31 = vsel %vm180_vm4, 0.0, %v177_v6  ;;  %v541_v32 = vstv %s1523_s14  ;;  %s1561_s14 = sld [smem:[#allocation7 + $0x205]] }
  0xa9   :  { %319 = vrot.lane.b32.xlu0 %v313_v33, %s1696_s25  ;;  %v525_v33 = vmul.f32 %v522_v24, %v1796_v53  ;;  %v543_v43 = vmul.f32 %v541_v32, %v1872_v38  ;;  %v639_v24 = vmul.f32 %v637_v9, %v1872_v38 }
  0xb0   :  { %323 = vrot.lane.b32.xlu2 %v315_v35, %s1696_s25  ;;  %321 = vrot.lane.b32.xlu1 %v314_v36, %s1696_s25  ;;  %v542_v35 = vmul.f32 %v541_v32, %v1859_v31 }
  0xb1   :  { %338 = vrot.lane.b32.xlu0 %v332_v37, %s1696_s25 }
  0xb8   :  { %342 = vrot.lane.b32.xlu2 %v334_v39, %s1696_s25  ;;  %340 = vrot.lane.b32.xlu1 %v333_v40, %s1696_s25  ;;  %v1875_v39 = vsel %vm180_vm4, %v179_v14, 0.0 }
  0xb9   :  { %357 = vrot.lane.b32.xlu0 %v351_v41, %s1696_s25  ;;  %2752 = vst [vmem:[#allocation14_spill] sm:$0xff] %v1875_v39  ;;  %v561_v41 = vstv %s1532_s15  ;;  %v544_v42 = vmul.f32 %v541_v32, %v1875_v39  ;;  %s2209_s15 = sld [smem:[#allocation7 + $0x300]] }
  0xc0   :  { %361 = vrot.lane.b32.xlu2 %v353_v44, %s1696_s25  ;;  %359 = vrot.lane.b32.xlu1 %v352_v45, %s1696_s25  ;;  %v562_v44 = vmul.f32 %v561_v41, %v1859_v31 }
  0xc1   :  { %376 = vrot.lane.b32.xlu0 %v370_v46, %s1696_s25 }
  0xc8   :  { %380 = vrot.lane.b32.xlu2 %v372_v50, %s1696_s25  ;;  %378 = vrot.lane.b32.xlu1 %v371_v51, %s1696_s25  ;;  %v564_v50 = vmul.f32 %v561_v41, %v1875_v39  ;;  %v563_v51 = vmul.f32 %v561_v41, %v1872_v38  ;;  %s1560_s25 = sld [smem:[#allocation7 + $0x204]] }
  0xc9   :  { %395 = vrot.lane.b32.xlu0 %v389_v49, %s1697_s7  ;;  %v580_v49 = vstv %s1541_s17  ;;  %s1579_s17 = sld [smem:[#allocation7 + $0x305]] }
  0xca   :  { %v581_v52 = vmul.f32 %v580_v49, %v1859_v31  ;;  %v583_v59 = vmul.f32 %v580_v49, %v1875_v39 }
  0xd0   :  { %399 = vrot.lane.b32.xlu2 %v391_v55, %s1697_s7  ;;  %397 = vrot.lane.b32.xlu1 %v390_v57, %s1697_s7 }
  0xd1   :  { %415 = vrot.lane.b32.xlu0 %v409_v58, %s1697_s7  ;;  %v599_v58 = vstv %s1550_s18  ;;  %s1588_s18 = sld [smem:[#allocation7 + $0x385]] }
  0xd2   :  { %v601_v3 = vmul.f32 %v599_v58, %v1872_v38 }
  0xd8   :  { %419 = vrot.lane.b32.xlu2 %v411_v60, %s1697_s7  ;;  %417 = vrot.lane.b32.xlu1 %v410_v61, %s1697_s7  ;;  %v582_v60 = vmul.f32 %v580_v49, %v1872_v38  ;;  %v600_v61 = vmul.f32 %v599_v58, %v1859_v31  ;;  %v694_v49 = vstv %s1524_s23  ;;  %s1553_s23 = sld [smem:[#allocation7 + $0x186]] }
  0xd9   :  { %434 = vrot.lane.b32.xlu0 %v428_v62, %s1697_s7 }
  0xe0   :  { %438 = vrot.lane.b32.xlu2 %v430_v0, %s1697_s7  ;;  %436 = vrot.lane.b32.xlu1 %v429_v1, %s1697_s7  ;;  %v618_v1 = vstv %s1559_s19  ;;  %s1526_s19 = sld [smem:[#allocation7 + $0x6]] }
  0xe1   :  { %453 = vrot.lane.b32.xlu0 %v447_v2, %s1697_s7  ;;  %v602_v2 = vmul.f32 %v599_v58, %v1875_v39 }
  0xe8   :  { %457 = vrot.lane.b32.xlu2 %v449_v4, %s1697_s7  ;;  %455 = vrot.lane.b32.xlu1 %v448_v5, %s1697_s7  ;;  %v619_v4 = vmul.f32 %v618_v1, %v1859_v31 }
  0xe9   :  { %472 = vrot.lane.b32.xlu0 %v466_v7, %s1697_s7 }
  0xea   :  { %v1826_v8 = vpop.permute.xlu2 %246 }
  0xf0   :  { %476 = vrot.lane.b32.xlu2 %v468_v10, %s1697_s7  ;;  %474 = vrot.lane.b32.xlu1 %v467_v11, %s1697_s7  ;;  %v621_v10 = vmul.f32 %v618_v1, %v1875_v39  ;;  %v620_v11 = vmul.f32 %v618_v1, %v1872_v38  ;;  %v697_v1 = vmul.f32 %v694_v49, %v1743_v18 }
  0xf1   :  { %491 = vrot.lane.b32.xlu0 %v485_v12, %s1697_s7  ;;  %v638_v12 = vmul.f32 %v637_v9, %v1859_v31 }
  0xf2   :  { %v1834_v15 = vpop.permute.xlu2 %266 }
  0xf8   :  { %495 = vrot.lane.b32.xlu2 %v487_v19, %s1697_s7  ;;  %493 = vrot.lane.b32.xlu1 %v486_v20, %s1697_s7  ;;  %v656_v20 = vstv %s1577_s21  ;;  %s1701_s21 = smov 96  }
  0xf9   :  { %510 = vrot.lane.b32.xlu0 %v504_v21, %s1697_s7  ;;  %v640_v21 = vmul.f32 %v637_v9, %v1875_v39 }
  0xfa   :  { %v1842_v22 = vpop.permute.xlu2 %285  ;;  %v1844_v23 = vpop.permute.xlu0 %242 }
 0x100   :  { %514 = vrot.lane.b32.xlu2 %v506_v25, %s1697_s7  ;;  %512 = vrot.lane.b32.xlu1 %v505_v26, %s1697_s7  ;;  %v657_v25 = vmul.f32 %v656_v20, %v1859_v31 }
 0x101   :  { %529 = vrot.lane.b32.xlu0 %v523_v27, %s1697_s7 }
 0x102   :  { %v1852_v28 = vpop.permute.xlu2 %304  ;;  %v1854_v29 = vpop.permute.xlu1 %244 }
 0x103   :  { %v1856_v30 = vpop.permute.xlu0 %262 }
 0x108   :  { %533 = vrot.lane.b32.xlu2 %v525_v33, %s1697_s7  ;;  %531 = vrot.lane.b32.xlu1 %v524_v34, %s1697_s7  ;;  %v675_v33 = vstv %s1586_s22  ;;  %v659_v34 = vmul.f32 %v656_v20, %v1875_v39  ;;  %s1534_s7 = sld [smem:[#allocation7 + $0x85]] }
 0x109   :  { %548 = vrot.lane.b32.xlu0 %v542_v35, %s1698_s16  ;;  %v658_v35 = vmul.f32 %v656_v20, %v1872_v38  ;;  %v676_v41 = vmul.f32 %v675_v33, %v1859_v31  ;;  %s1544_s22 = sld [smem:[#allocation7 + $0x106]] }
 0x10a   :  { %v1867_v36 = vpop.permute.xlu2 %323  ;;  %v1869_v37 = vpop.permute.xlu1 %264 }
 0x10b   :  { %v1877_v40 = vpop.permute.xlu0 %281 }
 0x110   :  { %552 = vrot.lane.b32.xlu2 %v544_v42, %s1698_s16  ;;  %550 = vrot.lane.b32.xlu1 %v543_v43, %s1698_s16 }
 0x111   :  { %568 = vrot.lane.b32.xlu0 %v562_v44, %s1698_s16 }
 0x112   :  { %v1885_v45 = vpop.permute.xlu2 %342  ;;  %v1887_v46 = vpop.permute.xlu1 %283 }
 0x113   :  { %v1889_v48 = vpop.permute.xlu0 %300 }
 0x118   :  { %572 = vrot.lane.b32.xlu2 %v564_v50, %s1698_s16  ;;  %570 = vrot.lane.b32.xlu1 %v563_v51, %s1698_s16  ;;  %v678_v50 = vmul.f32 %v675_v33, %v1875_v39  ;;  %v677_v51 = vmul.f32 %v675_v33, %v1872_v38  ;;  %v232_v39 = vstv %s1583_s28  ;;  %s1545_s28 = sld [smem:[#allocation7 + $0x107]] }
 0x119   :  { %587 = vrot.lane.b32.xlu0 %v581_v52, %s1698_s16  ;;  %v695_v52 = vmul.f32 %v694_v49, %v1735_v13 }
 0x11a   :  { %v1897_v55 = vpop.permute.xlu2 %361  ;;  %v1899_v56 = vpop.permute.xlu1 %302 }
 0x11b   :  { %2753 = vst [vmem:[#allocation15_spill] sm:$0xff] %v1897_v55  ;;  %v1901_v57 = vpop.permute.xlu0 %319 }
 0x120   :  { %591 = vrot.lane.b32.xlu2 %v583_v59, %s1698_s16  ;;  %589 = vrot.lane.b32.xlu1 %v582_v60, %s1698_s16 }
 0x121   :  { %606 = vrot.lane.b32.xlu0 %v600_v61, %s1698_s16  ;;  %v714_v61 = vstv %s1533_s24  ;;  %s1562_s24 = sld [smem:[#allocation7 + $0x206]] }
 0x122   :  { %v1909_v62 = vpop.permute.xlu2 %380  ;;  %v1911_v63 = vpop.permute.xlu1 %321  ;;  %v716_v20 = vmul.f32 %v714_v61, %v1740_v17 }
 0x123   :  { %v1913_v0 = vpop.permute.xlu0 %338 }
 0x128   :  { %610 = vrot.lane.b32.xlu2 %v602_v2, %s1698_s16  ;;  %608 = vrot.lane.b32.xlu1 %v601_v3, %s1698_s16  ;;  %v696_v2 = vmul.f32 %v694_v49, %v1740_v17  ;;  %v715_v3 = vmul.f32 %v714_v61, %v1735_v13 }
 0x129   :  { %625 = vrot.lane.b32.xlu0 %v619_v4, %s1698_s16 }
 0x12a   :  { %v1921_v5 = vpop.permute.xlu2 %399  ;;  %v1923_v6 = vpop.permute.xlu1 %340 }
 0x12b   :  { %v1925_v7 = vpop.permute.xlu0 %357 }
 0x12c   :  { %2754 = vst [vmem:[#allocation16_spill] sm:$0xff] %v1925_v7 }
 0x130   :  { %629 = vrot.lane.b32.xlu2 %v621_v10, %s1698_s16  ;;  %627 = vrot.lane.b32.xlu1 %v620_v11, %s1698_s16  ;;  %v733_v11 = vstv %s1542_s1  ;;  %s1580_s1 = sld [smem:[#allocation7 + $0x306]] }
 0x131   :  { %644 = vrot.lane.b32.xlu0 %v638_v12, %s1698_s16  ;;  %v717_v12 = vmul.f32 %v714_v61, %v1743_v18  ;;  %v771_v61 = vstv %s1560_s25  ;;  %s1527_s25 = sld [smem:[#allocation7 + $0x7]] }
 0x132   :  { %v1933_v14 = vpop.permute.xlu2 %419  ;;  %v1935_v16 = vpop.permute.xlu1 %359 }
 0x133   :  { %2755 = vst [vmem:[#allocation17_spill] sm:$0xff] %v1935_v16  ;;  %v1937_v19 = vpop.permute.xlu0 %376  ;;  %v211_v16 = vstv %s2031_s29  ;;  %s1554_s29 = sld [smem:[#allocation7 + $0x187]] }
 0x138   :  { %648 = vrot.lane.b32.xlu2 %v640_v21, %s1698_s16  ;;  %646 = vrot.lane.b32.xlu1 %v639_v24, %s1698_s16  ;;  %v734_v21 = vmul.f32 %v733_v11, %v1735_v13 }
 0x139   :  { %663 = vrot.lane.b32.xlu0 %v657_v25, %s1698_s16 }
 0x13a   :  { %v1945_v26 = vpop.permute.xlu2 %438  ;;  %v1947_v27 = vpop.permute.xlu1 %378 }
 0x13b   :  { %v1949_v32 = vpop.permute.xlu0 %395 }
 0x140   :  { %667 = vrot.lane.b32.xlu2 %v659_v34, %s1698_s16  ;;  %665 = vrot.lane.b32.xlu1 %v658_v35, %s1698_s16  ;;  %v752_v34 = vstv %s1551_s2  ;;  %v736_v35 = vmul.f32 %v733_v11, %v1743_v18  ;;  %s1589_s2 = sld [smem:[#allocation7 + $0x386]] }
 0x141   :  { %682 = vrot.lane.b32.xlu0 %v676_v41, %s1698_s16  ;;  %v735_v41 = vmul.f32 %v733_v11, %v1740_v17  ;;  %v753_v49 = vmul.f32 %v752_v34, %v1735_v13 }
 0x142   :  { %v1957_v42 = vpop.permute.xlu2 %457  ;;  %v1959_v43 = vpop.permute.xlu1 %397 }
 0x143   :  { %v1961_v44 = vpop.permute.xlu0 %415 }
 0x148   :  { %686 = vrot.lane.b32.xlu2 %v678_v50, %s1698_s16  ;;  %684 = vrot.lane.b32.xlu1 %v677_v51, %s1698_s16  ;;  %s1570_s16 = sld [smem:[#allocation7 + $0x285]] }
 0x149   :  { %701 = vrot.lane.b32.xlu0 %v695_v52, %s1699_s0 }
 0x14a   :  { %v1969_v58 = vpop.permute.xlu2 %476  ;;  %v1971_v59 = vpop.permute.xlu1 %417 }
 0x14b   :  { %v1973_v60 = vpop.permute.xlu0 %434 }
 0x150   :  { %705 = vrot.lane.b32.xlu2 %v697_v1, %s1699_s0  ;;  %703 = vrot.lane.b32.xlu1 %v696_v2, %s1699_s0  ;;  %v755_v1 = vmul.f32 %v752_v34, %v1743_v18  ;;  %v754_v2 = vmul.f32 %v752_v34, %v1740_v17  ;;  %v773_v34 = vmul.f32 %v771_v61, %v1740_v17 }
 0x151   :  { %721 = vrot.lane.b32.xlu0 %v715_v3, %s1699_s0  ;;  %v772_v3 = vmul.f32 %v771_v61, %v1735_v13 }
 0x152   :  { %v1981_v4 = vpop.permute.xlu2 %495  ;;  %v1983_v9 = vpop.permute.xlu1 %436 }
 0x153   :  { %2756 = vst [vmem:[#allocation18_spill] sm:$0xff] %v1981_v4  ;;  %v1985_v10 = vpop.permute.xlu0 %453 }
 0x158   :  { %725 = vrot.lane.b32.xlu2 %v717_v12, %s1699_s0  ;;  %723 = vrot.lane.b32.xlu1 %v716_v20, %s1699_s0 }
 0x159   :  { %740 = vrot.lane.b32.xlu0 %v734_v21, %s1699_s0  ;;  %v790_v21 = vstv %s1569_s26  ;;  %s1536_s26 = sld [smem:[#allocation7 + $0x87]] }
 0x15a   :  { %v1993_v24 = vpop.permute.xlu2 %514  ;;  %v1995_v25 = vpop.permute.xlu1 %455 }
 0x15b   :  { %2757 = vst [vmem:[#allocation19_spill] sm:$0xff] %v1993_v24  ;;  %v1997_v33 = vpop.permute.xlu0 %472 }
 0x160   :  { %744 = vrot.lane.b32.xlu2 %v736_v35, %s1699_s0  ;;  %742 = vrot.lane.b32.xlu1 %v735_v41, %s1699_s0  ;;  %v774_v35 = vmul.f32 %v771_v61, %v1743_v18  ;;  %v791_v41 = vmul.f32 %v790_v21, %v1735_v13  ;;  %v793_v61 = vmul.f32 %v790_v21, %v1743_v18 }
 0x161   :  { %759 = vrot.lane.b32.xlu0 %v753_v49, %s1699_s0 }
 0x162   :  { %v534_v50 = vpop.permute.xlu2 %533  ;;  %v2005_v51 = vpop.permute.xlu1 %474 }
 0x163   :  { %v2007_v52 = vpop.permute.xlu0 %491 }
 0x168   :  { %763 = vrot.lane.b32.xlu2 %v755_v1, %s1699_s0  ;;  %761 = vrot.lane.b32.xlu1 %v754_v2, %s1699_s0 }
 0x169   :  { %778 = vrot.lane.b32.xlu0 %v772_v3, %s1699_s0  ;;  %v809_v3 = vstv %s1578_s27  ;;  %s1702_s27 = smov 95  }
 0x16a   :  { %v2015_v11 = vpop.permute.xlu2 %552  ;;  %v2017_v12 = vpop.permute.xlu1 %493  ;;  %v810_v24 = vmul.f32 %v809_v3, %v1735_v13 }
 0x16b   :  { %v2019_v20 = vpop.permute.xlu0 %510 }
 0x16c   :  { %2758 = vst [vmem:[#allocation20_spill] sm:$0xff] %v2019_v20  ;;  %v233_v20 = vmul.f32 %v232_v39, %v1859_v31 }
 0x170   :  { %782 = vrot.lane.b32.xlu2 %v774_v35, %s1699_s0  ;;  %780 = vrot.lane.b32.xlu1 %v773_v34, %s1699_s0  ;;  %v792_v35 = vmul.f32 %v790_v21, %v1740_v17  ;;  %v382_v34 = vsel %vm248_vm5, %v1937_v19, %v1947_v27 }
 0x171   :  { %797 = vrot.lane.b32.xlu0 %v791_v41, %s1699_s0  ;;  %v383_v41 = vsel %vm248_vm5, %v1947_v27, %v1909_v62  ;;  %v386_v21 = vadd.f32 %v382_v34, %v233_v20  ;;  %v250_v20 = vsel %vm248_vm5, %v1854_v29, %v1826_v8 }
 0x172   :  { %v2027_v49 = vpop.permute.xlu2 %572  ;;  %v2029_v1 = vpop.permute.xlu1 %512 }
 0x173   :  { %2759 = vst [vmem:[#allocation21_spill] sm:$0xff] %v2029_v1  ;;  %v530_v2 = vpop.permute.xlu0 %529  ;;  %v234_v1 = vmul.f32 %v232_v39, %v1872_v38 }
 0x175   :  { %v387_v55 = vadd.f32 %v383_v41, %v234_v1  ;;  %v212_v1 = vmul.f32 %v211_v16, %v1859_v31 }
 0x178   :  { %801 = vrot.lane.b32.xlu2 %v793_v61, %s1699_s0  ;;  %799 = vrot.lane.b32.xlu1 %v792_v35, %s1699_s0  ;;  %v828_v35 = vstv %s1587_s30  ;;  %s1563_s30 = sld [smem:[#allocation7 + $0x207]] }
 0x179   :  { %816 = vrot.lane.b32.xlu0 %v810_v24, %s1699_s0  ;;  %v249_v24 = vsel %vm248_vm5, %v1844_v23, %v1854_v29  ;;  %v403_v23 = vsel %vm401_vm6, %v1959_v43, %v1921_v5  ;;  %v829_v34 = vmul.f32 %v828_v35, %v1735_v13 }
 0x17a   :  { %v2047_v19 = vpop.permute.xlu2 %591  ;;  %v532_v7 = vpop.permute.xlu1 %531  ;;  %v253_v8 = vadd.f32 %v249_v24, %v212_v1  ;;  %v268_v1 = vsel %vm248_vm5, %v1856_v30, %v1869_v37  ;;  %v422_v30 = vsel %vm401_vm6, %v1971_v59, %v1933_v14 }
 0x17b   :  { %v535_v62 = vsel %vm401_vm6, %v530_v2, %v532_v7  ;;  %v536_v27 = vsel %vm401_vm6, %v532_v7, %v534_v50  ;;  %v549_v39 = vpop.permute.xlu0 %548  ;;  %v213_v2 = vmul.f32 %v211_v16, %v1872_v38  ;;  %v812_v7 = vmul.f32 %v809_v3, %v1743_v18 }
 0x17c   :  { %v2054_v4 = vadd.f32 %v535_v62, %v386_v21  ;;  %v2056_v61 = vadd.f32 %v536_v27, %v387_v55  ;;  %v811_v55 = vmul.f32 %v809_v3, %v1740_v17  ;;  %v402_v50 = vsel %vm401_vm6, %v1949_v32, %v1959_v43 }
 0x17d   :  { %v254_v29 = vadd.f32 %v250_v20, %v213_v2  ;;  %v406_v16 = vadd.f32 %v402_v50, %v253_v8  ;;  %v214_v21 = vstv %s2050_s4  ;;  %v847_v20 = vstv %s1525_s5  ;;  %s1572_s4 = sld [smem:[#allocation7 + $0x287]] }
 0x17e   :  { %v269_v2 = vsel %vm248_vm5, %v1869_v37, %v1834_v15  ;;  %v421_v50 = vsel %vm401_vm6, %v1961_v44, %v1971_v59  ;;  %s1581_s5 = sld [smem:[#allocation7 + $0x307]] }
 0x17f   :  { %v407_v3 = vadd.f32 %v403_v23, %v254_v29  ;;  %v848_v23 = vmul.f32 %v847_v20, %v1788_v47  ;;  %v217_v29 = vstv %s2081_s6  ;;  %s1590_s6 = sld [smem:[#allocation7 + $0x387]] }
 0x180   :  { %820 = vrot.lane.b32.xlu2 %v812_v7, %s1699_s0  ;;  %818 = vrot.lane.b32.xlu1 %v811_v55, %s1699_s0  ;;  %v216_v7 = vmul.f32 %v214_v21, %v1872_v38  ;;  %v830_v55 = vmul.f32 %v828_v35, %v1740_v17 }
 0x181   :  { %835 = vrot.lane.b32.xlu0 %v829_v34, %s1699_s0 }
 0x182   :  { %v2078_v41 = vpop.permute.xlu2 %610  ;;  %v551_v32 = vpop.permute.xlu1 %550  ;;  %v273_v37 = vadd.f32 %v269_v2, %v216_v7  ;;  %v849_v2 = vmul.f32 %v847_v20, %v1800_v54 }
 0x183   :  { %v555_v5 = vsel %vm554_vm7, %v549_v39, %v551_v32  ;;  %v556_v43 = vsel %vm554_vm7, %v551_v32, %v2015_v11  ;;  %v569_v62 = vpop.permute.xlu0 %568  ;;  %v215_v39 = vmul.f32 %v214_v21, %v1859_v31  ;;  %v831_v11 = vmul.f32 %v828_v35, %v1743_v18 }
 0x184   :  { %v2086_v27 = vadd.f32 %v555_v5, %v406_v16  ;;  %v2088_v24 = vadd.f32 %v556_v43, %v407_v3  ;;  %v426_v34 = vadd.f32 %v422_v30, %v273_v37  ;;  %v867_v21 = vstv %s1534_s7  ;;  %s1528_s7 = sld [smem:[#allocation7 + $0x8]] }
 0x185   :  { %v272_v15 = vadd.f32 %v268_v1, %v215_v39  ;;  %v287_v5 = vsel %vm248_vm5, %v1877_v40, %v1887_v46  ;;  %v288_v43 = vsel %vm248_vm5, %v1887_v46, %v1842_v22  ;;  %v850_v1 = vmul.f32 %v847_v20, %v1796_v53 }
 0x186   :  { %v440_v39 = vsel %vm401_vm6, %v1973_v60, %v1983_v9  ;;  %v441_v40 = vsel %vm401_vm6, %v1983_v9, %v1945_v26  ;;  %v868_v7 = vmul.f32 %v867_v21, %v1788_v47  ;;  %v220_v60 = vstv %s2113_s9  ;;  %s1703_s9 = smov 94  }
 0x187   :  { %v425_v35 = vadd.f32 %v421_v50, %v272_v15  ;;  %v886_v37 = vstv %s1543_s10  ;;  %s1546_s10 = sld [smem:[#allocation7 + $0x108]] }
 0x188   :  { %839 = vrot.lane.b32.xlu2 %v831_v11, %s1699_s0  ;;  %837 = vrot.lane.b32.xlu1 %v830_v55, %s1699_s0  ;;  %s1571_s0 = sld [smem:[#allocation7 + $0x286]] }
 0x189   :  { %854 = vrot.lane.b32.xlu0 %v848_v23, %s1700_s8 }
 0x18a   :  { %v2110_v8 = vpop.permute.xlu2 %629  ;;  %v571_v44 = vpop.permute.xlu1 %570 }
 0x18b   :  { %v574_v14 = vsel %vm554_vm7, %v569_v62, %v571_v44  ;;  %v575_v59 = vsel %vm554_vm7, %v571_v44, %v2027_v49  ;;  %v588_v16 = vpop.permute.xlu0 %587  ;;  %v218_v62 = vmul.f32 %v217_v29, %v1859_v31  ;;  %v219_v49 = vmul.f32 %v217_v29, %v1872_v38 }
 0x18c   :  { %v2118_v3 = vadd.f32 %v574_v14, %v425_v35  ;;  %v2120_v32 = vadd.f32 %v575_v59, %v426_v34  ;;  %v306_v35 = vsel %vm248_vm5, %v1889_v48, %v1899_v56  ;;  %v307_v34 = vsel %vm248_vm5, %v1899_v56, %v1852_v28 }
 0x18d   :  { %v291_v22 = vadd.f32 %v287_v5, %v218_v62  ;;  %v292_v46 = vadd.f32 %v288_v43, %v219_v49  ;;  %v221_v44 = vmul.f32 %v220_v60, %v1859_v31  ;;  %v870_v29 = vmul.f32 %v867_v21, %v1796_v53 }
 0x18e   :  { %v869_v14 = vmul.f32 %v867_v21, %v1800_v54  ;;  %v459_v59 = vsel %vm401_vm6, %v1985_v10, %v1995_v25  ;;  %v460_v48 = vsel %vm401_vm6, %v1995_v25, %v1957_v42  ;;  %v223_v10 = vstv %s2145_s11  ;;  %s1555_s11 = sld [smem:[#allocation7 + $0x188]] }
 0x18f   :  { %v444_v11 = vadd.f32 %v440_v39, %v291_v22  ;;  %v445_v20 = vadd.f32 %v441_v40, %v292_v46  ;;  %v310_v28 = vadd.f32 %v306_v35, %v221_v44  ;;  %v905_v39 = vstv %s1552_s12  ;;  %s1564_s12 = sld [smem:[#allocation7 + $0x208]] }
 0x190   :  { %858 = vrot.lane.b32.xlu2 %v850_v1, %s1700_s8  ;;  %856 = vrot.lane.b32.xlu1 %v849_v2, %s1700_s8  ;;  %v325_v40 = vsel %vm248_vm5, %v1901_v57, %v1911_v63  ;;  %v224_v22 = vmul.f32 %v223_v10, %v1859_v31  ;;  %v889_v46 = vmul.f32 %v886_v37, %v1796_v53  ;;  %v924_v44 = vstv %s1561_s14  ;;  %s1582_s14 = sld [smem:[#allocation7 + $0x308]] }
 0x191   :  { %874 = vrot.lane.b32.xlu0 %v868_v7, %s1700_s8  ;;  %v463_v5 = vadd.f32 %v459_v59, %v310_v28  ;;  %v326_v7 = vsel %vm248_vm5, %v1911_v63, %v1867_v36  ;;  %v479_v57 = vsel %vm401_vm6, %v2005_v51, %v1969_v58  ;;  %v908_v59 = vmul.f32 %v905_v39, %v1796_v53  ;;  %v2760_v28 = vld [vmem:[#allocation18_spill] sm:$0xff] }
 0x192   :  { %v2142_v55 = vpop.permute.xlu2 %648  ;;  %v590_v50 = vpop.permute.xlu1 %589  ;;  %v329_v36 = vadd.f32 %v325_v40, %v224_v22  ;;  %v943_v40 = vstv %s1570_s16  ;;  %v2762_v22 = vld [vmem:[#allocation16_spill] sm:$0xff]  ;;  %s126_s16 = sld [smem:[#allocation8]] }
 0x193   :  { %v593_v26 = vsel %vm554_vm7, %v588_v16, %v590_v50  ;;  %v594_v9 = vsel %vm554_vm7, %v590_v50, %v2047_v19  ;;  %v607_v30 = vpop.permute.xlu0 %606  ;;  %v222_v19 = vmul.f32 %v220_v60, %v1872_v38  ;;  %v887_v16 = vmul.f32 %v886_v37, %v1788_v47 }
 0x194   :  { %v2150_v23 = vadd.f32 %v593_v26, %v444_v11  ;;  %v2152_v15 = vadd.f32 %v594_v9, %v445_v20  ;;  %v888_v11 = vmul.f32 %v886_v37, %v1800_v54  ;;  %v478_v20 = vsel %vm401_vm6, %v1997_v33, %v2005_v51 }
 0x195   :  { %v311_v56 = vadd.f32 %v307_v34, %v222_v19  ;;  %v906_v50 = vmul.f32 %v905_v39, %v1788_v47  ;;  %v482_v60 = vadd.f32 %v478_v20, %v329_v36  ;;  %v226_v33 = vstv %s2177_s13  ;;  %v2764_v36 = vld [vmem:[#allocation21_spill] sm:$0xff]  ;;  %s1573_s13 = sld [smem:[#allocation7 + $0x288]] }
 0x196   :  { %v344_v19 = vsel %vm248_vm5, %v1913_v0, %v1923_v6  ;;  %v498_v0 = vsel %vm401_vm6, %v2017_v12, %v2760_v28  ;;  %v962_v28 = vstv %s1579_s17  ;;  %s1592_s17 = sld [smem:[#allocation8 + $0x1]] }
 0x197   :  { %v464_v21 = vadd.f32 %v460_v48, %v311_v56  ;;  %v907_v48 = vmul.f32 %v905_v39, %v1800_v54  ;;  %v925_v56 = vmul.f32 %v924_v44, %v1788_v47 }
 0x198   :  { %878 = vrot.lane.b32.xlu2 %v870_v29, %s1700_s8  ;;  %876 = vrot.lane.b32.xlu1 %v869_v14, %s1700_s8  ;;  %v345_v29 = vsel %vm248_vm5, %v1923_v6, %v1885_v45  ;;  %v227_v14 = vmul.f32 %v226_v33, %v1859_v31 }
 0x199   :  { %893 = vrot.lane.b32.xlu0 %v887_v16, %s1700_s8  ;;  %v497_v16 = vsel %vm401_vm6, %v2007_v52, %v2017_v12 }
 0x19a   :  { %v2174_v43 = vpop.permute.xlu2 %667  ;;  %v609_v62 = vpop.permute.xlu1 %608  ;;  %v348_v45 = vadd.f32 %v344_v19, %v227_v14 }
 0x19b   :  { %v612_v42 = vsel %vm554_vm7, %v607_v30, %v609_v62  ;;  %v613_v25 = vsel %vm554_vm7, %v609_v62, %v2078_v41  ;;  %v626_v49 = vpop.permute.xlu0 %625  ;;  %v225_v41 = vmul.f32 %v223_v10, %v1872_v38 }
 0x19c   :  { %v2182_v1 = vadd.f32 %v612_v42, %v463_v5  ;;  %v2184_v2 = vadd.f32 %v613_v25, %v464_v21  ;;  %v501_v5 = vadd.f32 %v497_v16, %v348_v45  ;;  %v229_v42 = vstv %s2209_s15  ;;  %s1591_s15 = sld [smem:[#allocation7 + $0x388]] }
 0x19d   :  { %v330_v63 = vadd.f32 %v326_v7, %v225_v41  ;;  %v2761_v7 = vld [vmem:[#allocation17_spill] sm:$0xff]  ;;  %v230_v20 = vmul.f32 %v229_v42, %v1859_v31  ;;  %v963_v45 = vmul.f32 %v962_v28, %v1788_v47 }
 0x19e   :  { %v363_v41 = vsel %vm248_vm5, %v2762_v22, %v2761_v7 }
 0x19f   :  { %v483_v26 = vadd.f32 %v479_v57, %v330_v63  ;;  %v231_v57 = vmul.f32 %v229_v42, %v1872_v38  ;;  %v2765_v63 = vld [vmem:[#allocation20_spill] sm:$0xff] }
 0x1a0   :  { %897 = vrot.lane.b32.xlu2 %v889_v46, %s1700_s8  ;;  %895 = vrot.lane.b32.xlu1 %v888_v11, %s1700_s8  ;;  %v2763_v46 = vld [vmem:[#allocation15_spill] sm:$0xff] }
 0x1a1   :  { %912 = vrot.lane.b32.xlu0 %v906_v50, %s1700_s8  ;;  %v364_v11 = vsel %vm248_vm5, %v2761_v7, %v2763_v46  ;;  %v926_v50 = vmul.f32 %v924_v44, %v1800_v54 }
 0x1a2   :  { %v2206_v9 = vpop.permute.xlu2 %686  ;;  %v628_v30 = vpop.permute.xlu1 %627 }
 0x1a3   :  { %v631_v58 = vsel %vm554_vm7, %v626_v49, %v628_v30  ;;  %v632_v51 = vsel %vm554_vm7, %v628_v30, %v2110_v8  ;;  %v645_v37 = vpop.permute.xlu0 %644  ;;  %v228_v8 = vmul.f32 %v226_v33, %v1872_v38  ;;  %v944_v33 = vmul.f32 %v943_v40, %v1788_v47 }
 0x1a4   :  { %v2214_v35 = vadd.f32 %v631_v58, %v482_v60  ;;  %v2216_v34 = vadd.f32 %v632_v51, %v483_v26  ;;  %v516_v60 = vsel %vm401_vm6, %v2765_v63, %v2764_v36  ;;  %v2766_v26 = vld [vmem:[#allocation19_spill] sm:$0xff]  ;;  %v367_v58 = vadd.f32 %v363_v41, %v230_v20 }
 0x1a5   :  { %v349_v6 = vadd.f32 %v345_v29, %v228_v8  ;;  %v517_v30 = vsel %vm401_vm6, %v2764_v36, %v2766_v26  ;;  %v368_v51 = vadd.f32 %v364_v11, %v231_v57  ;;  %v1000_v20 = vstv %s1526_s19  ;;  %s1594_s19 = sld [smem:[#allocation8 + $0x3]] }
 0x1a7   :  { %v502_v21 = vadd.f32 %v498_v0, %v349_v6  ;;  %v946_v0 = vmul.f32 %v943_v40, %v1796_v53 }
 0x1a8   :  { %916 = vrot.lane.b32.xlu2 %v908_v59, %s1700_s8  ;;  %914 = vrot.lane.b32.xlu1 %v907_v48, %s1700_s8 }
 0x1a9   :  { %931 = vrot.lane.b32.xlu0 %v925_v56, %s1700_s8  ;;  %v945_v56 = vmul.f32 %v943_v40, %v1800_v54  ;;  %v964_v40 = vmul.f32 %v962_v28, %v1800_v54 }
 0x1aa   :  { %v706_v62 = vpop.permute.xlu2 %705  ;;  %v647_v10 = vpop.permute.xlu1 %646 }
 0x1ab   :  { %v650_v52 = vsel %vm554_vm7, %v645_v37, %v647_v10  ;;  %v651_v12 = vsel %vm554_vm7, %v647_v10, %v2142_v55  ;;  %v664_v25 = vpop.permute.xlu0 %663  ;;  %v927_v55 = vmul.f32 %v924_v44, %v1796_v53  ;;  %v520_v37 = vadd.f32 %v516_v60, %v367_v58 }
 0x1ac   :  { %v2242_v49 = vadd.f32 %v650_v52, %v501_v5  ;;  %v2244_v39 = vadd.f32 %v651_v12, %v502_v21  ;;  %v521_v44 = vadd.f32 %v517_v30, %v368_v51  ;;  %v981_v12 = vstv %s1588_s18  ;;  %s1593_s18 = sld [smem:[#allocation8 + $0x2]] }
 0x1ad   :  { %v982_v7 = vmul.f32 %v981_v12, %v1788_v47  ;;  %v984_v57 = vmul.f32 %v981_v12, %v1796_v53  ;;  %v1020_v30 = vstv %s1535_s20  ;;  %v1002_v51 = vmul.f32 %v1000_v20, %v1872_v38  ;;  %s1595_s20 = sld [smem:[#allocation8 + $0x4]] }
 0x1b0   :  { %935 = vrot.lane.b32.xlu2 %v927_v55, %s1700_s8  ;;  %933 = vrot.lane.b32.xlu1 %v926_v50, %s1700_s8  ;;  %v983_v55 = vmul.f32 %v981_v12, %v1800_v54  ;;  %v1001_v50 = vmul.f32 %v1000_v20, %v1859_v31 }
 0x1b1   :  { %950 = vrot.lane.b32.xlu0 %v944_v33, %s1700_s8  ;;  %v2767_v33 = vld [vmem:[#allocation14_spill] sm:$0xff] }
 0x1b2   :  { %v726_v19 = vpop.permute.xlu2 %725  ;;  %v666_v29 = vpop.permute.xlu1 %665  ;;  %v1003_v58 = vmul.f32 %v1000_v20, %v2767_v33 }
 0x1b3   :  { %v669_v14 = vsel %vm554_vm7, %v664_v25, %v666_v29  ;;  %v670_v8 = vsel %vm554_vm7, %v666_v29, %v2174_v43  ;;  %v683_v59 = vpop.permute.xlu0 %682  ;;  %v965_v25 = vmul.f32 %v962_v28, %v1796_v53  ;;  %v1023_v28 = vmul.f32 %v1020_v30, %v2767_v33 }
 0x1b4   :  { %v2269_v48 = vadd.f32 %v669_v14, %v520_v37  ;;  %v2271_v16 = vadd.f32 %v670_v8, %v521_v44  ;;  %v1021_v37 = vmul.f32 %v1020_v30, %v1859_v31 }
 0x1b8   :  { %954 = vrot.lane.b32.xlu2 %v946_v0, %s1700_s8  ;;  %952 = vrot.lane.b32.xlu1 %v945_v56, %s1700_s8  ;;  %v1022_v0 = vmul.f32 %v1020_v30, %v1872_v38 }
 0x1b9   :  { %969 = vrot.lane.b32.xlu0 %v963_v45, %s1700_s8 }
 0x1ba   :  { %v745_v43 = vpop.permute.xlu2 %744  ;;  %v685_v6 = vpop.permute.xlu1 %684 }
 0x1bb   :  { %v688_v5 = vsel %vm554_vm7, %v683_v59, %v685_v6  ;;  %v689_v21 = vsel %vm554_vm7, %v685_v6, %v2206_v9  ;;  %v702_v10 = vpop.permute.xlu0 %701  ;;  %v1039_v59 = vstv %s1544_s22  ;;  %s1597_s22 = sld [smem:[#allocation8 + $0x6]] }
 0x1bc   :  { %v2283_v42 = vadd.f32 %v688_v5, %v2054_v4  ;;  %v2286_v52 = vadd.f32 %v689_v21, %v2056_v61  ;;  %v1040_v56 = vmul.f32 %v1039_v59, %v1859_v31  ;;  %v1042_v12 = vmul.f32 %v1039_v59, %v2767_v33 }
 0x1c0   :  { %973 = vrot.lane.b32.xlu2 %v965_v25, %s1700_s8  ;;  %971 = vrot.lane.b32.xlu1 %v964_v40, %s1700_s8  ;;  %v1041_v25 = vmul.f32 %v1039_v59, %v1872_v38 }
 0x1c1   :  { %988 = vrot.lane.b32.xlu0 %v982_v7, %s1700_s8 }
 0x1c2   :  { %v764_v4 = vpop.permute.xlu2 %763  ;;  %v704_v9 = vpop.permute.xlu1 %703 }
 0x1c3   :  { %v708_v61 = vsel %vm707_vm8, %v702_v10, %v704_v9  ;;  %v709_v22 = vsel %vm707_vm8, %v704_v9, %v706_v62  ;;  %v722_v41 = vpop.permute.xlu0 %721  ;;  %v1058_v10 = vstv %s1553_s23  ;;  %s1598_s23 = sld [smem:[#allocation8 + $0x7]] }
 0x1c4   :  { %v2297_v46 = vadd.f32 %v708_v61, %v2086_v27  ;;  %v2300_v11 = vadd.f32 %v709_v22, %v2088_v24  ;;  %v1059_v40 = vmul.f32 %v1058_v10, %v1859_v31  ;;  %v1061_v20 = vmul.f32 %v1058_v10, %v2767_v33 }
 0x1c8   :  { %992 = vrot.lane.b32.xlu2 %v984_v57, %s1700_s8  ;;  %990 = vrot.lane.b32.xlu1 %v983_v55, %s1700_s8  ;;  %v1060_v57 = vmul.f32 %v1058_v10, %v1872_v38  ;;  %s1537_s8 = sld [smem:[#allocation7 + $0x88]] }
 0x1c9   :  { %1007 = vrot.lane.b32.xlu0 %v1001_v50, %s1701_s21 }
 0x1ca   :  { %v783_v27 = vpop.permute.xlu2 %782  ;;  %v724_v62 = vpop.permute.xlu1 %723 }
 0x1cb   :  { %v727_v24 = vsel %vm707_vm8, %v722_v41, %v724_v62  ;;  %v728_v36 = vsel %vm707_vm8, %v724_v62, %v726_v19  ;;  %v741_v63 = vpop.permute.xlu0 %740  ;;  %v1077_v41 = vstv %s1562_s24  ;;  %s1704_s24 = smov [#allocation9]  }
 0x1cc   :  { %v2311_v60 = vadd.f32 %v727_v24, %v2118_v3  ;;  %v2314_v26 = vadd.f32 %v728_v36, %v2120_v32  ;;  %v1078_v55 = vmul.f32 %v1077_v41, %v1859_v31  ;;  %v1080_v30 = vmul.f32 %v1077_v41, %v2767_v33 }
 0x1d0   :  { %1011 = vrot.lane.b32.xlu2 %v1003_v58, %s1701_s21  ;;  %1009 = vrot.lane.b32.xlu1 %v1002_v51, %s1701_s21  ;;  %v1079_v58 = vmul.f32 %v1077_v41, %v1872_v38 }
 0x1d1   :  { %1027 = vrot.lane.b32.xlu0 %v1021_v37, %s1701_s21 }
 0x1d2   :  { %v802_v44 = vpop.permute.xlu2 %801  ;;  %v743_v3 = vpop.permute.xlu1 %742 }
 0x1d3   :  { %v746_v19 = vsel %vm707_vm8, %v741_v63, %v743_v3  ;;  %v747_v32 = vsel %vm707_vm8, %v743_v3, %v745_v43  ;;  %v760_v29 = vpop.permute.xlu0 %759  ;;  %v1096_v63 = vstv %s1571_s0  ;;  %s1507_s0 = sshll.u32 %s1704_s24, 4  ;;  %s1508_s0 = int_to_ptr.vmem [resolvable:$true] %s1507_s0 }
 0x1d4   :  { %v2325_v14 = vadd.f32 %v746_v19, %v2150_v23  ;;  %v2328_v8 = vadd.f32 %v747_v32, %v2152_v15  ;;  %v1097_v51 = vmul.f32 %v1096_v63, %v1859_v31  ;;  %v1099_v59 = vmul.f32 %v1096_v63, %v2767_v33 }
 0x1d8   :  { %1031 = vrot.lane.b32.xlu2 %v1023_v28, %s1701_s21  ;;  %1029 = vrot.lane.b32.xlu1 %v1022_v0, %s1701_s21  ;;  %v1098_v28 = vmul.f32 %v1096_v63, %v1872_v38 }
 0x1d9   :  { %1046 = vrot.lane.b32.xlu0 %v1040_v56, %s1701_s21 }
 0x1da   :  { %v821_v45 = vpop.permute.xlu2 %820  ;;  %v762_v23 = vpop.permute.xlu1 %761 }
 0x1db   :  { %v765_v43 = vsel %vm707_vm8, %v760_v29, %v762_v23  ;;  %v766_v15 = vsel %vm707_vm8, %v762_v23, %v764_v4  ;;  %v779_v6 = vpop.permute.xlu0 %778  ;;  %v1115_v29 = vstv %s1580_s1 }
 0x1dc   :  { %v2339_v5 = vadd.f32 %v765_v43, %v2182_v1  ;;  %v2342_v21 = vadd.f32 %v766_v15, %v2184_v2  ;;  %v1116_v0 = vmul.f32 %v1115_v29, %v1859_v31  ;;  %v1118_v10 = vmul.f32 %v1115_v29, %v2767_v33 }
 0x1e0   :  { %1050 = vrot.lane.b32.xlu2 %v1042_v12, %s1701_s21  ;;  %1048 = vrot.lane.b32.xlu1 %v1041_v25, %s1701_s21  ;;  %v1117_v12 = vmul.f32 %v1115_v29, %v1872_v38 }
 0x1e1   :  { %1065 = vrot.lane.b32.xlu0 %v1059_v40, %s1701_s21 }
 0x1e2   :  { %v840_v7 = vpop.permute.xlu2 %839  ;;  %v781_v1 = vpop.permute.xlu1 %780 }
 0x1e3   :  { %v784_v4 = vsel %vm707_vm8, %v779_v6, %v781_v1  ;;  %v785_v2 = vsel %vm707_vm8, %v781_v1, %v783_v27  ;;  %v798_v9 = vpop.permute.xlu0 %797  ;;  %v1134_v6 = vstv %s1589_s2 }
 0x1e4   :  { %v2353_v61 = vadd.f32 %v784_v4, %v2214_v35  ;;  %v2356_v22 = vadd.f32 %v785_v2, %v2216_v34  ;;  %v1135_v25 = vmul.f32 %v1134_v6, %v1859_v31  ;;  %v1153_v31 = vstv %s1527_s25  ;;  %s1509_s25 = sshll.u32 %s2747_s3, 4  ;;  %s1510_s25 = int_to_ptr.hbm [resolvable:$true] %s1509_s25 }
 0x1e5   :  { %v1136_v41 = vmul.f32 %v1134_v6, %v1872_v38 }
 0x1e8   :  { %1069 = vrot.lane.b32.xlu2 %v1061_v20, %s1701_s21  ;;  %1067 = vrot.lane.b32.xlu1 %v1060_v57, %s1701_s21  ;;  %v1154_v20 = vmul.f32 %v1153_v31, %v1735_v13 }
 0x1e9   :  { %1084 = vrot.lane.b32.xlu0 %v1078_v55, %s1701_s21 }
 0x1ea   :  { %v859_v50 = vpop.permute.xlu2 %858  ;;  %v800_v35 = vpop.permute.xlu1 %799 }
 0x1eb   :  { %v803_v27 = vsel %vm707_vm8, %v798_v9, %v800_v35  ;;  %v804_v34 = vsel %vm707_vm8, %v800_v35, %v802_v44  ;;  %v817_v62 = vpop.permute.xlu0 %816  ;;  %v1137_v9 = vmul.f32 %v1134_v6, %v2767_v33  ;;  %v1173_v35 = vstv %s1536_s26 }
 0x1ec   :  { %v2367_v24 = vadd.f32 %v803_v27, %v2242_v49  ;;  %v2370_v36 = vadd.f32 %v804_v34, %v2244_v39  ;;  %v1156_v27 = vmul.f32 %v1153_v31, %v1743_v18  ;;  %v1155_v34 = vmul.f32 %v1153_v31, %v1740_v17 }
 0x1f0   :  { %1088 = vrot.lane.b32.xlu2 %v1080_v30, %s1701_s21  ;;  %1086 = vrot.lane.b32.xlu1 %v1079_v58, %s1701_s21 }
 0x1f1   :  { %1103 = vrot.lane.b32.xlu0 %v1097_v51, %s1701_s21 }
 0x1f2   :  { %v879_v37 = vpop.permute.xlu2 %878  ;;  %v819_v49 = vpop.permute.xlu1 %818 }
 0x1f3   :  { %v822_v44 = vsel %vm707_vm8, %v817_v62, %v819_v49  ;;  %v823_v39 = vsel %vm707_vm8, %v819_v49, %v821_v45  ;;  %v836_v3 = vpop.permute.xlu0 %835  ;;  %v1174_v62 = vmul.f32 %v1173_v35, %v1735_v13  ;;  %v1192_v49 = vstv %s1545_s28 }
 0x1f4   :  { %v2381_v19 = vadd.f32 %v822_v44, %v2269_v48  ;;  %v2384_v32 = vadd.f32 %v823_v39, %v2271_v16  ;;  %v1176_v44 = vmul.f32 %v1173_v35, %v1743_v18  ;;  %v1175_v39 = vmul.f32 %v1173_v35, %v1740_v17 }
 0x1f8   :  { %1107 = vrot.lane.b32.xlu2 %v1099_v59, %s1701_s21  ;;  %1105 = vrot.lane.b32.xlu1 %v1098_v28, %s1701_s21 }
 0x1f9   :  { %1122 = vrot.lane.b32.xlu0 %v1116_v0, %s1701_s21 }
 0x1fa   :  { %v898_v56 = vpop.permute.xlu2 %897  ;;  %v838_v48 = vpop.permute.xlu1 %837 }
 0x1fb   :  { %v841_v45 = vsel %vm707_vm8, %v836_v3, %v838_v48  ;;  %v842_v16 = vsel %vm707_vm8, %v838_v48, %v840_v7  ;;  %v855_v23 = vpop.permute.xlu0 %854  ;;  %v1193_v3 = vmul.f32 %v1192_v49, %v1735_v13  ;;  %v1211_v48 = vstv %s1554_s29 }
 0x1fc   :  { %v2395_v43 = vadd.f32 %v841_v45, %v2283_v42  ;;  %v2398_v15 = vadd.f32 %v842_v16, %v2286_v52  ;;  %v1195_v45 = vmul.f32 %v1192_v49, %v1743_v18  ;;  %v1194_v16 = vmul.f32 %v1192_v49, %v1740_v17 }
 0x200   :  { %1126 = vrot.lane.b32.xlu2 %v1118_v10, %s1701_s21  ;;  %1124 = vrot.lane.b32.xlu1 %v1117_v12, %s1701_s21 }
 0x201   :  { %1141 = vrot.lane.b32.xlu0 %v1135_v25, %s1701_s21 }
 0x202   :  { %v917_v42 = vpop.permute.xlu2 %916  ;;  %v857_v40 = vpop.permute.xlu1 %856 }
 0x203   :  { %v861_v52 = vsel %vm860_vm9, %v855_v23, %v857_v40  ;;  %v862_v7 = vsel %vm860_vm9, %v857_v40, %v859_v50  ;;  %v875_v1 = vpop.permute.xlu0 %874  ;;  %v1212_v23 = vmul.f32 %v1211_v48, %v1735_v13  ;;  %v1230_v40 = vstv %s1563_s30 }
 0x204   :  { %v2409_v4 = vadd.f32 %v861_v52, %v2297_v46  ;;  %v2412_v2 = vadd.f32 %v862_v7, %v2300_v11  ;;  %v1214_v52 = vmul.f32 %v1211_v48, %v1743_v18  ;;  %v1213_v7 = vmul.f32 %v1211_v48, %v1740_v17 }
 0x208   :  { %1145 = vrot.lane.b32.xlu2 %v1137_v9, %s1701_s21  ;;  %1143 = vrot.lane.b32.xlu1 %v1136_v41, %s1701_s21  ;;  %s1596_s21 = sld [smem:[#allocation8 + $0x5]] }
 0x209   :  { %1160 = vrot.lane.b32.xlu0 %v1154_v20, %s1702_s27 }
 0x20a   :  { %v936_v46 = vpop.permute.xlu2 %935  ;;  %v877_v57 = vpop.permute.xlu1 %876 }
 0x20b   :  { %v880_v11 = vsel %vm860_vm9, %v875_v1, %v877_v57  ;;  %v881_v55 = vsel %vm860_vm9, %v877_v57, %v879_v37  ;;  %v894_v50 = vpop.permute.xlu0 %893  ;;  %v1231_v1 = vmul.f32 %v1230_v40, %v1735_v13  ;;  %v1249_v57 = vstv %s1572_s4 }
 0x20c   :  { %v2423_v33 = vadd.f32 %v880_v11, %v2311_v60  ;;  %v2426_v38 = vadd.f32 %v881_v55, %v2314_v26  ;;  %v1233_v11 = vmul.f32 %v1230_v40, %v1743_v18  ;;  %v1232_v55 = vmul.f32 %v1230_v40, %v1740_v17 }
 0x210   :  { %1164 = vrot.lane.b32.xlu2 %v1156_v27, %s1702_s27  ;;  %1162 = vrot.lane.b32.xlu1 %v1155_v34, %s1702_s27 }
 0x211   :  { %1180 = vrot.lane.b32.xlu0 %v1174_v62, %s1702_s27 }
 0x212   :  { %v955_v63 = vpop.permute.xlu2 %954  ;;  %v896_v60 = vpop.permute.xlu1 %895 }
 0x213   :  { %v899_v30 = vsel %vm860_vm9, %v894_v50, %v896_v60  ;;  %v900_v26 = vsel %vm860_vm9, %v896_v60, %v898_v56  ;;  %v913_v58 = vpop.permute.xlu0 %912  ;;  %v1250_v50 = vmul.f32 %v1249_v57, %v1735_v13  ;;  %v1268_v60 = vstv %s1581_s5 }
 0x214   :  { %v2437_v51 = vadd.f32 %v899_v30, %v2325_v14  ;;  %v2440_v37 = vadd.f32 %v900_v26, %v2328_v8  ;;  %v1252_v30 = vmul.f32 %v1249_v57, %v1743_v18  ;;  %v1251_v26 = vmul.f32 %v1249_v57, %v1740_v17 }
 0x218   :  { %1184 = vrot.lane.b32.xlu2 %v1176_v44, %s1702_s27  ;;  %1182 = vrot.lane.b32.xlu1 %v1175_v39, %s1702_s27 }
 0x219   :  { %1199 = vrot.lane.b32.xlu0 %v1193_v3, %s1702_s27 }
 0x21a   :  { %v974_v29 = vpop.permute.xlu2 %973  ;;  %v915_v14 = vpop.permute.xlu1 %914 }
 0x21b   :  { %v918_v59 = vsel %vm860_vm9, %v913_v58, %v915_v14  ;;  %v919_v8 = vsel %vm860_vm9, %v915_v14, %v917_v42  ;;  %v932_v28 = vpop.permute.xlu0 %931  ;;  %v1269_v58 = vmul.f32 %v1268_v60, %v1735_v13  ;;  %v1287_v14 = vstv %s1590_s6 }
 0x21c   :  { %v2451_v0 = vadd.f32 %v918_v59, %v2339_v5  ;;  %v2454_v56 = vadd.f32 %v919_v8, %v2342_v21  ;;  %v1271_v59 = vmul.f32 %v1268_v60, %v1743_v18  ;;  %v1270_v8 = vmul.f32 %v1268_v60, %v1740_v17 }
 0x220   :  { %1203 = vrot.lane.b32.xlu2 %v1195_v45, %s1702_s27  ;;  %1201 = vrot.lane.b32.xlu1 %v1194_v16, %s1702_s27 }
 0x221   :  { %1218 = vrot.lane.b32.xlu0 %v1212_v23, %s1702_s27 }
 0x222   :  { %v993_v6 = vpop.permute.xlu2 %992  ;;  %v934_v5 = vpop.permute.xlu1 %933 }
 0x223   :  { %v937_v10 = vsel %vm860_vm9, %v932_v28, %v934_v5  ;;  %v938_v21 = vsel %vm860_vm9, %v934_v5, %v936_v46  ;;  %v951_v12 = vpop.permute.xlu0 %950  ;;  %v1288_v28 = vmul.f32 %v1287_v14, %v1735_v13  ;;  %v1306_v13 = vstv %s1528_s7 }
 0x224   :  { %v2465_v25 = vadd.f32 %v937_v10, %v2353_v61  ;;  %v2468_v42 = vadd.f32 %v938_v21, %v2356_v22  ;;  %v1290_v5 = vmul.f32 %v1287_v14, %v1743_v18  ;;  %v1289_v10 = vmul.f32 %v1287_v14, %v1740_v17 }
 0x225   :  { %v1307_v21 = vmul.f32 %v1306_v13, %v1788_v47 }
 0x228   :  { %1222 = vrot.lane.b32.xlu2 %v1214_v52, %s1702_s27  ;;  %1220 = vrot.lane.b32.xlu1 %v1213_v7, %s1702_s27  ;;  %v1326_v7 = vstv %s1537_s8 }
 0x229   :  { %1237 = vrot.lane.b32.xlu0 %v1231_v1, %s1702_s27  ;;  %v1309_v1 = vmul.f32 %v1306_v13, %v1796_v53 }
 0x22a   :  { %v1012_v31 = vpop.permute.xlu2 %1011  ;;  %v953_v61 = vpop.permute.xlu1 %952 }
 0x22b   :  { %v956_v9 = vsel %vm860_vm9, %v951_v12, %v953_v61  ;;  %v957_v22 = vsel %vm860_vm9, %v953_v61, %v955_v63  ;;  %v970_v41 = vpop.permute.xlu0 %969  ;;  %v1327_v61 = vmul.f32 %v1326_v7, %v1788_v47 }
 0x22c   :  { %v2479_v20 = vadd.f32 %v956_v9, %v2367_v24  ;;  %v2482_v46 = vadd.f32 %v957_v22, %v2370_v36 }
 0x230   :  { %1241 = vrot.lane.b32.xlu2 %v1233_v11, %s1702_s27  ;;  %1239 = vrot.lane.b32.xlu1 %v1232_v55, %s1702_s27  ;;  %v1345_v55 = vstv %s1546_s10 }
 0x231   :  { %1256 = vrot.lane.b32.xlu0 %v1250_v50, %s1702_s27  ;;  %v1329_v50 = vmul.f32 %v1326_v7, %v1796_v53 }
 0x232   :  { %v1032_v35 = vpop.permute.xlu2 %1031  ;;  %v972_v24 = vpop.permute.xlu1 %971 }
 0x233   :  { %v975_v27 = vsel %vm860_vm9, %v970_v41, %v972_v24  ;;  %v976_v36 = vsel %vm860_vm9, %v972_v24, %v974_v29  ;;  %v989_v34 = vpop.permute.xlu0 %988  ;;  %v1346_v24 = vmul.f32 %v1345_v55, %v1788_v47 }
 0x234   :  { %v2493_v62 = vadd.f32 %v975_v27, %v2381_v19  ;;  %v2496_v63 = vadd.f32 %v976_v36, %v2384_v32 }
 0x238   :  { %1260 = vrot.lane.b32.xlu2 %v1252_v30, %s1702_s27  ;;  %1258 = vrot.lane.b32.xlu1 %v1251_v26, %s1702_s27  ;;  %v1364_v26 = vstv %s1555_s11 }
 0x239   :  { %1275 = vrot.lane.b32.xlu0 %v1269_v58, %s1702_s27  ;;  %v1348_v58 = vmul.f32 %v1345_v55, %v1796_v53 }
 0x23a   :  { %v1051_v49 = vpop.permute.xlu2 %1050  ;;  %v991_v19 = vpop.permute.xlu1 %990 }
 0x23b   :  { %v994_v44 = vsel %vm860_vm9, %v989_v34, %v991_v19  ;;  %v995_v32 = vsel %vm860_vm9, %v991_v19, %v993_v6  ;;  %v1008_v39 = vpop.permute.xlu0 %1007  ;;  %v1365_v19 = vmul.f32 %v1364_v26, %v1788_v47 }
 0x23c   :  { %v2507_v3 = vadd.f32 %v994_v44, %v2395_v43  ;;  %v2510_v29 = vadd.f32 %v995_v32, %v2398_v15 }
 0x240   :  { %1279 = vrot.lane.b32.xlu2 %v1271_v59, %s1702_s27  ;;  %1277 = vrot.lane.b32.xlu1 %v1270_v8, %s1702_s27  ;;  %v1383_v8 = vstv %s1564_s12 }
 0x241   :  { %1294 = vrot.lane.b32.xlu0 %v1288_v28, %s1702_s27  ;;  %v1367_v28 = vmul.f32 %v1364_v26, %v1796_v53 }
 0x242   :  { %v1070_v43 = vpop.permute.xlu2 %1069  ;;  %v1010_v48 = vpop.permute.xlu1 %1009 }
 0x243   :  { %v1014_v15 = vsel %vm1013_vm10, %v1008_v39, %v1010_v48  ;;  %v1015_v45 = vsel %vm1013_vm10, %v1010_v48, %v1012_v31  ;;  %v1028_v16 = vpop.permute.xlu0 %1027  ;;  %v1308_v31 = vmul.f32 %v1306_v13, %v1800_v54  ;;  %v1384_v48 = vmul.f32 %v1383_v8, %v1788_v47 }
 0x244   :  { %v2521_v23 = vadd.f32 %v1014_v15, %v2409_v4  ;;  %v2524_v6 = vadd.f32 %v1015_v45, %v2412_v2 }
 0x248   :  { %1298 = vrot.lane.b32.xlu2 %v1290_v5, %s1702_s27  ;;  %1296 = vrot.lane.b32.xlu1 %v1289_v10, %s1702_s27  ;;  %v1402_v10 = vstv %s1573_s13 }
 0x249   :  { %1313 = vrot.lane.b32.xlu0 %v1307_v21, %s1703_s9  ;;  %v1386_v21 = vmul.f32 %v1383_v8, %v1796_v53 }
 0x24a   :  { %v1089_v4 = vpop.permute.xlu2 %1088  ;;  %v1030_v12 = vpop.permute.xlu1 %1029 }
 0x24b   :  { %v1033_v2 = vsel %vm1013_vm10, %v1028_v16, %v1030_v12  ;;  %v1034_v40 = vsel %vm1013_vm10, %v1030_v12, %v1032_v35  ;;  %v1047_v52 = vpop.permute.xlu0 %1046  ;;  %v1328_v35 = vmul.f32 %v1326_v7, %v1800_v54  ;;  %v1403_v12 = vmul.f32 %v1402_v10, %v1788_v47 }
 0x24c   :  { %v2535_v18 = vadd.f32 %v1033_v2, %v2423_v33  ;;  %v2538_v17 = vadd.f32 %v1034_v40, %v2426_v38 }
 0x250   :  { %1317 = vrot.lane.b32.xlu2 %v1309_v1, %s1703_s9  ;;  %1315 = vrot.lane.b32.xlu1 %v1308_v31, %s1703_s9  ;;  %v1421_v31 = vstv %s1582_s14 }
 0x251   :  { %1333 = vrot.lane.b32.xlu0 %v1327_v61, %s1703_s9  ;;  %v1405_v61 = vmul.f32 %v1402_v10, %v1796_v53 }
 0x252   :  { %v1108_v9 = vpop.permute.xlu2 %1107  ;;  %v1049_v33 = vpop.permute.xlu1 %1048 }
 0x253   :  { %v1052_v22 = vsel %vm1013_vm10, %v1047_v52, %v1049_v33  ;;  %v1053_v38 = vsel %vm1013_vm10, %v1049_v33, %v1051_v49  ;;  %v1066_v41 = vpop.permute.xlu0 %1065  ;;  %v1347_v49 = vmul.f32 %v1345_v55, %v1800_v54  ;;  %v1422_v33 = vmul.f32 %v1421_v31, %v1788_v47 }
 0x254   :  { %v2549_v57 = vadd.f32 %v1052_v22, %v2437_v51  ;;  %v2552_v11 = vadd.f32 %v1053_v38, %v2440_v37 }
 0x258   :  { %1337 = vrot.lane.b32.xlu2 %v1329_v50, %s1703_s9  ;;  %1335 = vrot.lane.b32.xlu1 %v1328_v35, %s1703_s9  ;;  %v1440_v35 = vstv %s1591_s15 }
 0x259   :  { %1352 = vrot.lane.b32.xlu0 %v1346_v24, %s1703_s9  ;;  %v1424_v24 = vmul.f32 %v1421_v31, %v1796_v53 }
 0x25a   :  { %v1127_v27 = vpop.permute.xlu2 %1126  ;;  %v1068_v51 = vpop.permute.xlu1 %1067 }
 0x25b   :  { %v1071_v36 = vsel %vm1013_vm10, %v1066_v41, %v1068_v51  ;;  %v1072_v37 = vsel %vm1013_vm10, %v1068_v51, %v1070_v43  ;;  %v1085_v34 = vpop.permute.xlu0 %1084  ;;  %v1366_v43 = vmul.f32 %v1364_v26, %v1800_v54  ;;  %v1441_v51 = vmul.f32 %v1440_v35, %v1788_v47 }
 0x25c   :  { %v2563_v60 = vadd.f32 %v1071_v36, %v2451_v0  ;;  %v2566_v30 = vadd.f32 %v1072_v37, %v2454_v56 }
 0x260   :  { %1356 = vrot.lane.b32.xlu2 %v1348_v58, %s1703_s9  ;;  %1354 = vrot.lane.b32.xlu1 %v1347_v49, %s1703_s9 }
 0x261   :  { %1371 = vrot.lane.b32.xlu0 %v1365_v19, %s1703_s9 }
 0x262   :  { %v1146_v44 = vpop.permute.xlu2 %1145  ;;  %v1087_v0 = vpop.permute.xlu1 %1086 }
 0x263   :  { %v1090_v32 = vsel %vm1013_vm10, %v1085_v34, %v1087_v0  ;;  %v1091_v56 = vsel %vm1013_vm10, %v1087_v0, %v1089_v4  ;;  %v1104_v39 = vpop.permute.xlu0 %1103  ;;  %v1385_v4 = vmul.f32 %v1383_v8, %v1800_v54  ;;  %v1442_v34 = vmul.f32 %v1440_v35, %v1800_v54 }
 0x264   :  { %v2577_v14 = vadd.f32 %v1090_v32, %v2465_v25  ;;  %v2580_v59 = vadd.f32 %v1091_v56, %v2468_v42 }
 0x268   :  { %1375 = vrot.lane.b32.xlu2 %v1367_v28, %s1703_s9  ;;  %1373 = vrot.lane.b32.xlu1 %v1366_v43, %s1703_s9 }
 0x269   :  { %1390 = vrot.lane.b32.xlu0 %v1384_v48, %s1703_s9 }
 0x26a   :  { %v2588_v15 = vpop.permute.xlu2 %1164  ;;  %v1106_v25 = vpop.permute.xlu1 %1105 }
 0x26b   :  { %v1109_v42 = vsel %vm1013_vm10, %v1104_v39, %v1106_v25  ;;  %v1110_v45 = vsel %vm1013_vm10, %v1106_v25, %v1108_v9  ;;  %v1123_v16 = vpop.permute.xlu0 %1122  ;;  %v1404_v9 = vmul.f32 %v1402_v10, %v1800_v54 }
 0x26c   :  { %v2593_v13 = vadd.f32 %v1109_v42, %v2479_v20  ;;  %v2596_v5 = vadd.f32 %v1110_v45, %v2482_v46 }
 0x270   :  { %1394 = vrot.lane.b32.xlu2 %v1386_v21, %s1703_s9  ;;  %1392 = vrot.lane.b32.xlu1 %v1385_v4, %s1703_s9 }
 0x271   :  { %1409 = vrot.lane.b32.xlu0 %v1403_v12, %s1703_s9 }
 0x272   :  { %v2604_v2 = vpop.permute.xlu2 %1184  ;;  %v1125_v20 = vpop.permute.xlu1 %1124 }
 0x273   :  { %v1128_v46 = vsel %vm1013_vm10, %v1123_v16, %v1125_v20  ;;  %v1129_v40 = vsel %vm1013_vm10, %v1125_v20, %v1127_v27  ;;  %v1142_v52 = vpop.permute.xlu0 %1141  ;;  %v1423_v27 = vmul.f32 %v1421_v31, %v1800_v54 }
 0x274   :  { %v2609_v7 = vadd.f32 %v1128_v46, %v2493_v62  ;;  %v2612_v1 = vadd.f32 %v1129_v40, %v2496_v63  ;;  %v1459_v46 = vstv %s126_s16 }
 0x278   :  { %1413 = vrot.lane.b32.xlu2 %v1405_v61, %s1703_s9  ;;  %1411 = vrot.lane.b32.xlu1 %v1404_v9, %s1703_s9 }
 0x279   :  { %1428 = vrot.lane.b32.xlu0 %v1422_v33, %s1703_s9 }
 0x27a   :  { %v2620_v22 = vpop.permute.xlu2 %1203  ;;  %v1144_v62 = vpop.permute.xlu1 %1143 }
 0x27b   :  { %v1147_v63 = vsel %vm1013_vm10, %v1142_v52, %v1144_v62  ;;  %v1148_v38 = vsel %vm1013_vm10, %v1144_v62, %v1146_v44  ;;  %v1161_v41 = vpop.permute.xlu0 %1160 }
 0x27c   :  { %v2625_v55 = vadd.f32 %v1147_v63, %v2507_v3  ;;  %v2628_v50 = vadd.f32 %v1148_v38, %v2510_v29  ;;  %v1443_v29 = vmul.f32 %v1440_v35, %v1796_v53  ;;  %v1467_v35 = vstv %s1592_s17 }
 0x280   :  { %1432 = vrot.lane.b32.xlu2 %v1424_v24, %s1703_s9  ;;  %1430 = vrot.lane.b32.xlu1 %v1423_v27, %s1703_s9 }
 0x281   :  { %1447 = vrot.lane.b32.xlu0 %v1441_v51, %s1703_s9 }
 0x282   :  { %v2636_v36 = vpop.permute.xlu2 %1222  ;;  %v1163_v3 = vpop.permute.xlu1 %1162 }
 0x283   :  { %v1181_v37 = vpop.permute.xlu0 %1180  ;;  %v1167_v10 = vsel %vm1166_vm11, %v1161_v41, %v1163_v3  ;;  %v1168_v21 = vsel %vm1166_vm11, %v1163_v3, %v2588_v15 }
 0x284   :  { %v1171_v4 = vadd.f32 %v1167_v10, %v2521_v23  ;;  %v1172_v12 = vadd.f32 %v1168_v21, %v2524_v6 }
 0x288   :  { %1451 = vrot.lane.b32.xlu2 %v1443_v29, %s1703_s9  ;;  %1449 = vrot.lane.b32.xlu1 %v1442_v34, %s1703_s9 }
 0x28a   :  { %v1183_v26 = vpop.permute.xlu1 %1182  ;;  %v2642_v47 = vpop.permute.xlu2 %1241 }
 0x28b   :  { %v1200_v58 = vpop.permute.xlu0 %1199  ;;  %v1186_v63 = vsel %vm1166_vm11, %v1181_v37, %v1183_v26  ;;  %v1187_v15 = vsel %vm1166_vm11, %v1183_v26, %v2604_v2 }
 0x28c   :  { %v1190_v6 = vadd.f32 %v1186_v63, %v2535_v18  ;;  %v1191_v38 = vadd.f32 %v1187_v15, %v2538_v17 }
 0x292   :  { %v1202_v49 = vpop.permute.xlu1 %1201  ;;  %v2646_v44 = vpop.permute.xlu2 %1260 }
 0x293   :  { %v2644_v19 = vpop.permute.xlu0 %1218  ;;  %v1205_v2 = vsel %vm1166_vm11, %v1200_v58, %v1202_v49  ;;  %v1206_v26 = vsel %vm1166_vm11, %v1202_v49, %v2620_v22 }
 0x294   :  { %v1209_v17 = vadd.f32 %v1205_v2, %v2549_v57 }
 0x29a   :  { %v2648_v0 = vpop.permute.xlu1 %1220  ;;  %v2652_v53 = vpop.permute.xlu2 %1279 }
 0x29b   :  { %v2650_v32 = vpop.permute.xlu0 %1237  ;;  %v1224_v22 = vsel %vm1166_vm11, %v2644_v19, %v2648_v0  ;;  %v1225_v57 = vsel %vm1166_vm11, %v2648_v0, %v2636_v36 }
 0x29c   :  { %v1229_v49 = vadd.f32 %v1225_v57, %v2566_v30 }
 0x2a2   :  { %v2654_v54 = vpop.permute.xlu1 %1239  ;;  %v2658_v39 = vpop.permute.xlu2 %1298 }
 0x2a3   :  { %v2656_v56 = vpop.permute.xlu0 %1256  ;;  %v1243_v36 = vsel %vm1166_vm11, %v2650_v32, %v2654_v54 }
 0x2a4   :  { %v1247_v30 = vadd.f32 %v1243_v36, %v2577_v14 }
 0x2aa   :  { %v2660_v8 = vpop.permute.xlu1 %1258  ;;  %v1318_v48 = vpop.permute.xlu2 %1317 }
 0x2ab   :  { %v2662_v28 = vpop.permute.xlu0 %1275  ;;  %v1263_v14 = vsel %vm1166_vm11, %v2660_v8, %v2646_v44 }
 0x2b2   :  { %v2664_v43 = vpop.permute.xlu1 %1277  ;;  %v1338_v16 = vpop.permute.xlu2 %1337 }
 0x2b3   :  { %v2666_v25 = vpop.permute.xlu0 %1294  ;;  %v1281_v44 = vsel %vm1166_vm11, %v2662_v28, %v2664_v43 }
 0x2ba   :  { %v2668_v42 = vpop.permute.xlu1 %1296  ;;  %v1357_v23 = vpop.permute.xlu2 %1356 }
 0x2bb   :  { %v1314_v45 = vpop.permute.xlu0 %1313 }
 0x2c2   :  { %v1316_v20 = vpop.permute.xlu1 %1315  ;;  %v1376_v18 = vpop.permute.xlu2 %1375 }
 0x2c3   :  { %v1320_v40 = vsel %vm1319_vm12, %v1314_v45, %v1316_v20  ;;  %v1321_v52 = vsel %vm1319_vm12, %v1316_v20, %v1318_v48  ;;  %v1334_v31 = vpop.permute.xlu0 %1333  ;;  %v1210_v48 = vadd.f32 %v1206_v26, %v2552_v11  ;;  %v1228_v11 = vadd.f32 %v1224_v22, %v2563_v60 }
 0x2c4   :  { %v1324_v61 = vadd.f32 %v1320_v40, %v1171_v4  ;;  %v1325_v9 = vadd.f32 %v1321_v52, %v1172_v12  ;;  %v1244_v60 = vsel %vm1166_vm11, %v2654_v54, %v2642_v47  ;;  %v1262_v47 = vsel %vm1166_vm11, %v2656_v56, %v2660_v8 }
 0x2c5   :  { %v1248_v0 = vadd.f32 %v1244_v60, %v2580_v59  ;;  %v1266_v59 = vadd.f32 %v1262_v47, %v2593_v13  ;;  %v1267_v54 = vadd.f32 %v1263_v14, %v2596_v5  ;;  %v1282_v13 = vsel %vm1166_vm11, %v2664_v43, %v2652_v53 }
 0x2c6   :  { %v1460_v33 = vadd.f32 %v1459_v46, %v1324_v61  ;;  %v1461_v62 = vadd.f32 %v1459_v46, %v1325_v9  ;;  %v1300_v53 = vsel %vm1166_vm11, %v2666_v25, %v2668_v42 }
 0x2c7   :  { %v1304_v43 = vadd.f32 %v1300_v53, %v2625_v55 }
 0x2c8   :  { %1465 = vst [vmem:[#allocation9] sm:$0xff] %v1460_v33 }
 0x2c9   :  { %1466 = vst [vmem:[#allocation9 + $0x8] sm:$0xff] %v1461_v62 }
 0x2ca   :  { %v1336_v41 = vpop.permute.xlu1 %1335  ;;  %v1395_v52 = vpop.permute.xlu2 %1394 }
 0x2cb   :  { %v1339_v24 = vsel %vm1319_vm12, %v1334_v31, %v1336_v41  ;;  %v1340_v27 = vsel %vm1319_vm12, %v1336_v41, %v1338_v16  ;;  %v1353_v51 = vpop.permute.xlu0 %1352  ;;  %v1472_v16 = vstv %s1593_s18  ;;  %v1477_v31 = vstv %s1594_s19 }
 0x2cc   :  { %v1343_v3 = vadd.f32 %v1339_v24, %v1190_v6  ;;  %v1344_v37 = vadd.f32 %v1340_v27, %v1191_v38  ;;  %v1482_v6 = vstv %s1595_s20 }
 0x2ce   :  { %v1468_v29 = vadd.f32 %v1467_v35, %v1343_v3  ;;  %v1469_v34 = vadd.f32 %v1467_v35, %v1344_v37 }
 0x2d0   :  { %1470 = vst [vmem:[#allocation9 + $0x10] sm:$0xff] %v1468_v29  ;;  %v1487_v29 = vstv %s1596_s21 }
 0x2d1   :  { %1471 = vst [vmem:[#allocation9 + $0x18] sm:$0xff] %v1469_v34 }
 0x2d2   :  { %v1355_v45 = vpop.permute.xlu1 %1354  ;;  %v1414_v32 = vpop.permute.xlu2 %1413 }
 0x2d3   :  { %v1358_v10 = vsel %vm1319_vm12, %v1353_v51, %v1355_v45  ;;  %v1359_v21 = vsel %vm1319_vm12, %v1355_v45, %v1357_v23  ;;  %v1372_v4 = vpop.permute.xlu0 %1371  ;;  %v1286_v45 = vadd.f32 %v1282_v13, %v2612_v1 }
 0x2d4   :  { %v1362_v12 = vadd.f32 %v1358_v10, %v1209_v17  ;;  %v1363_v58 = vadd.f32 %v1359_v21, %v1210_v48  ;;  %v1285_v48 = vadd.f32 %v1281_v44, %v2609_v7  ;;  %v1492_v10 = vstv %s1597_s22 }
 0x2d5   :  { %v1301_v7 = vsel %vm1166_vm11, %v2668_v42, %v2658_v39 }
 0x2d6   :  { %v1473_v20 = vadd.f32 %v1472_v16, %v1362_v12  ;;  %v1474_v46 = vadd.f32 %v1472_v16, %v1363_v58 }
 0x2d8   :  { %1475 = vst [vmem:[#allocation9 + $0x20] sm:$0xff] %v1473_v20 }
 0x2d9   :  { %1476 = vst [vmem:[#allocation9 + $0x28] sm:$0xff] %v1474_v46  ;;  %v1305_v46 = vadd.f32 %v1301_v7, %v2628_v50 }
 0x2da   :  { %v1374_v40 = vpop.permute.xlu1 %1373  ;;  %v1433_v5 = vpop.permute.xlu2 %1432 }
 0x2db   :  { %v1377_v61 = vsel %vm1319_vm12, %v1372_v4, %v1374_v40  ;;  %v1378_v9 = vsel %vm1319_vm12, %v1374_v40, %v1376_v18  ;;  %v1391_v62 = vpop.permute.xlu0 %1390 }
 0x2dc   :  { %v1381_v33 = vadd.f32 %v1377_v61, %v1228_v11  ;;  %v1382_v19 = vadd.f32 %v1378_v9, %v1229_v49  ;;  %v1497_v11 = vstv %s1598_s23 }
 0x2de   :  { %v1478_v63 = vadd.f32 %v1477_v31, %v1381_v33  ;;  %v1479_v15 = vadd.f32 %v1477_v31, %v1382_v19 }
 0x2e0   :  { %1480 = vst [vmem:[#allocation9 + $0x30] sm:$0xff] %v1478_v63 }
 0x2e1   :  { %1481 = vst [vmem:[#allocation9 + $0x38] sm:$0xff] %v1479_v15 }
 0x2e2   :  { %v1393_v23 = vpop.permute.xlu1 %1392  ;;  %v1452_v1 = vpop.permute.xlu2 %1451 }
 0x2e3   :  { %v1396_v38 = vsel %vm1319_vm12, %v1391_v62, %v1393_v23  ;;  %v1397_v41 = vsel %vm1319_vm12, %v1393_v23, %v1395_v52  ;;  %v1410_v3 = vpop.permute.xlu0 %1409 }
 0x2e4   :  { %v1400_v35 = vadd.f32 %v1396_v38, %v1247_v30  ;;  %v1401_v24 = vadd.f32 %v1397_v41, %v1248_v0 }
 0x2e6   :  { %v1483_v27 = vadd.f32 %v1482_v6, %v1400_v35  ;;  %v1484_v51 = vadd.f32 %v1482_v6, %v1401_v24 }
 0x2e8   :  { %1485 = vst [vmem:[#allocation9 + $0x40] sm:$0xff] %v1483_v27 }
 0x2e9   :  { %1486 = vst [vmem:[#allocation9 + $0x48] sm:$0xff] %v1484_v51 }
 0x2ea   :  { %v1412_v37 = vpop.permute.xlu1 %1411 }
 0x2eb   :  { %v1415_v34 = vsel %vm1319_vm12, %v1410_v3, %v1412_v37  ;;  %v1416_v2 = vsel %vm1319_vm12, %v1412_v37, %v1414_v32  ;;  %v1429_v8 = vpop.permute.xlu0 %1428 }
 0x2ec   :  { %v1419_v26 = vadd.f32 %v1415_v34, %v1266_v59  ;;  %v1420_v18 = vadd.f32 %v1416_v2, %v1267_v54 }
 0x2ee   :  { %v1488_v56 = vadd.f32 %v1487_v29, %v1419_v26  ;;  %v1489_v17 = vadd.f32 %v1487_v29, %v1420_v18 }
 0x2f0   :  { %1490 = vst [vmem:[#allocation9 + $0x50] sm:$0xff] %v1488_v56 }
 0x2f1   :  { %1491 = vst [vmem:[#allocation9 + $0x58] sm:$0xff] %v1489_v17 }
 0x2f2   :  { %v1431_v16 = vpop.permute.xlu1 %1430 }
 0x2f3   :  { %v1434_v21 = vsel %vm1319_vm12, %v1429_v8, %v1431_v16  ;;  %v1435_v4 = vsel %vm1319_vm12, %v1431_v16, %v1433_v5  ;;  %v1448_v22 = vpop.permute.xlu0 %1447 }
 0x2f4   :  { %v1438_v28 = vadd.f32 %v1434_v21, %v1285_v48  ;;  %v1439_v12 = vadd.f32 %v1435_v4, %v1286_v45 }
 0x2f6   :  { %v1493_v58 = vadd.f32 %v1492_v10, %v1438_v28  ;;  %v1494_v20 = vadd.f32 %v1492_v10, %v1439_v12 }
 0x2f8   :  { %1495 = vst [vmem:[#allocation9 + $0x60] sm:$0xff] %v1493_v58 }
 0x2f9   :  { %1496 = vst [vmem:[#allocation9 + $0x68] sm:$0xff] %v1494_v20 }
 0x2fa   :  { %v1450_v57 = vpop.permute.xlu1 %1449 }
 0x2fb   :  { %v1453_v49 = vsel %vm1319_vm12, %v1448_v22, %v1450_v57  ;;  %v1454_v40 = vsel %vm1319_vm12, %v1450_v57, %v1452_v1 }
 0x2fc   :  { %v1457_v52 = vadd.f32 %v1453_v49, %v1304_v43  ;;  %v1458_v25 = vadd.f32 %v1454_v40, %v1305_v46 }
 0x2fe   :  { %v1498_v39 = vadd.f32 %v1497_v11, %v1457_v52  ;;  %v1499_v42 = vadd.f32 %v1497_v11, %v1458_v25 }
 0x300   :  { %1500 = vst [vmem:[#allocation9 + $0x70] sm:$0xff] %v1498_v39 }
 0x301   :  { %1501 = vst [vmem:[#allocation9 + $0x78] sm:$0xff] %v1499_v42 }
 0x302   :  { %1512 = dma.vmem_to_hbm [thread:$0]  %s1508_s0, 2048, %s1510_s25, [#allocation4]  }
 0x303   :  { %1690 = dma.done.wait [#allocation4], 2048  }
 0x304   :  { %1691 = vsyncadd [#allocation4], 4294965248 }
 0x305   :  { %1517 = vsyncpa [#allocation3], 1 }
 0x306   :  { %1518 = vsyncpa [#allocation4], 1 }
 0x307   :  { %1519 = vsyncpa [#allocation5], 1 }
 0x308   :  { %1520 = vsyncpa [#allocation6], 1 }

</bundles_post_ra>
